<compile_context>
chip_gen: v6e
topology: v6e:2x2x1
jax: 0.10.0
libtpu: 0.0.40
codegen_flags: <defaults>
</compile_context>

<pallas_src>
import functools
import math

import jax
import jax.numpy as jnp
from jax.experimental import pallas as pl
from jax.experimental.pallas import tpu as pltpu


# --------------------------- tiling / params helpers -------------------------

def _pick_tile(dim, pref, align=1):
    """Largest tile <= pref dividing dim, preferring multiples of `align`.

    Returns the full dim when it already fits under `pref` (a full-extent block
    is always layout-legal).  Falls back to the largest unaligned divisor only
    when no aligned divisor exists.
    """
    if dim <= pref:
        return dim
    fallback = 1
    for t in range(pref, 0, -1):
        if dim % t == 0:
            if t % align == 0:
                return t
            fallback = max(fallback, t)
    return fallback


def _compiler_params(sem, vmem_estimate=None):
    kwargs = dict(dimension_semantics=sem)
    # Raise scoped-VMEM limit only when the estimated per-step footprint
    # exceeds the 32 MiB default (large-model shapes).  Toy shapes never hit
    # this branch.  TODO(synk): per-generation budgets (v7x has 64 MiB VMEM).
    if vmem_estimate is not None and vmem_estimate > (32 << 20):
        kwargs["vmem_limit_bytes"] = int(min(vmem_estimate, 100 << 20))
    return pltpu.CompilerParams(**kwargs)


# --------------------------- fused linear (x @ w + b) ------------------------

def _linear_kernel(x_ref, w_ref, b_ref, o_ref, acc_ref):
    @pl.when(pl.program_id(2) == 0)
    def _():
        acc_ref[...] = jnp.zeros_like(acc_ref)

    acc_ref[...] += jnp.dot(x_ref[...].astype(jnp.bfloat16), w_ref[...],
                            preferred_element_type=jnp.float32)

    @pl.when(pl.program_id(2) == pl.num_programs(2) - 1)
    def _():
        o_ref[...] = (acc_ref[...] + b_ref[...]).astype(o_ref.dtype)


def pallas_linear(x, w, b, *, out_dtype=jnp.bfloat16, tm=512, tn=256, tk=512):
    """y = x @ w + b.  x:[M,K], w:[K,N] bf16, b:[N] f32 -> [M,N] out_dtype."""
    M, K = x.shape
    N = w.shape[1]
    tm = _pick_tile(M, tm, align=8)
    tn = _pick_tile(N, tn, align=128)
    tk = _pick_tile(K, tk, align=128)
    est = int(1.3 * (2 * tm * tk * x.dtype.itemsize + 2 * tk * tn * 2
                     + tm * tn * 4 + 2 * tm * tn * jnp.dtype(out_dtype).itemsize))
    return pl.pallas_call(
        _linear_kernel,
        out_shape=jax.ShapeDtypeStruct((M, N), out_dtype),
        grid=(M // tm, N // tn, K // tk),
        in_specs=[
            pl.BlockSpec((tm, tk), lambda i, j, k: (i, k)),
            pl.BlockSpec((tk, tn), lambda i, j, k: (k, j)),
            pl.BlockSpec((1, tn), lambda i, j, k: (0, j)),
        ],
        out_specs=pl.BlockSpec((tm, tn), lambda i, j, k: (i, j)),
        scratch_shapes=[pltpu.VMEM((tm, tn), jnp.float32)],
        compiler_params=_compiler_params(("parallel", "parallel", "arbitrary"),
                                         est),
    )(x, w, b.reshape(1, N))


# ------------------ fused output-projection + add + LayerNorm ----------------

def _proj_add_ln_kernel(ctx_ref, wo_ref, bo_ref, r_ref, g_ref, bln_ref, o_ref,
                        *, eps):
    y = jnp.dot(ctx_ref[...].astype(jnp.bfloat16), wo_ref[...],
                preferred_element_type=jnp.float32) + bo_ref[...]
    h = y + r_ref[...]                      # residual add (dropout = identity)
    mu = jnp.mean(h, axis=-1, keepdims=True)
    var = jnp.mean(jnp.square(h - mu), axis=-1, keepdims=True)
    o_ref[...] = (h - mu) * jax.lax.rsqrt(var + eps) * g_ref[...] + bln_ref[...]


def _proj_add_ln_q_kernel(ctx_ref, wo_ref, bo_ref, r_ref, g_ref, bln_ref,
                          wq_ref, bq_ref, o_ref, q_ref, *, eps):
    """Same as above but also emits q = LN_out @ w_q + b_q (cross-attn query)."""
    y = jnp.dot(ctx_ref[...].astype(jnp.bfloat16), wo_ref[...],
                preferred_element_type=jnp.float32) + bo_ref[...]
    h = y + r_ref[...]
    mu = jnp.mean(h, axis=-1, keepdims=True)
    var = jnp.mean(jnp.square(h - mu), axis=-1, keepdims=True)
    ln = (h - mu) * jax.lax.rsqrt(var + eps) * g_ref[...] + bln_ref[...]
    o_ref[...] = ln
    q_ref[...] = (jnp.dot(ln.astype(jnp.bfloat16), wq_ref[...],
                          preferred_element_type=jnp.float32)
                  + bq_ref[...]).astype(q_ref.dtype)


def pallas_proj_add_ln(ctx, w, b, resid, gamma, beta, *, eps=1e-5, tm=256):
    M, D = ctx.shape
    tm = _pick_tile(M, tm, align=8)
    return pl.pallas_call(
        functools.partial(_proj_add_ln_kernel, eps=eps),
        out_shape=jax.ShapeDtypeStruct((M, D), jnp.float32),
        grid=(M // tm,),
        in_specs=[
            pl.BlockSpec((tm, D), lambda i: (i, 0)),
            pl.BlockSpec((D, D), lambda i: (0, 0)),
            pl.BlockSpec((1, D), lambda i: (0, 0)),
            pl.BlockSpec((tm, D), lambda i: (i, 0)),
            pl.BlockSpec((1, D), lambda i: (0, 0)),
            pl.BlockSpec((1, D), lambda i: (0, 0)),
        ],
        out_specs=pl.BlockSpec((tm, D), lambda i: (i, 0)),
        compiler_params=_compiler_params(("parallel",)),
    )(ctx, w, b.reshape(1, D), resid, gamma.reshape(1, D), beta.reshape(1, D))


def pallas_proj_add_ln_q(ctx, w, b, resid, gamma, beta, wq, bq, *,
                         eps=1e-5, tm=256):
    M, D = ctx.shape
    tm = _pick_tile(M, tm, align=8)
    return pl.pallas_call(
        functools.partial(_proj_add_ln_q_kernel, eps=eps),
        out_shape=(jax.ShapeDtypeStruct((M, D), jnp.float32),    # LN output
                   jax.ShapeDtypeStruct((M, D), jnp.bfloat16)),  # fused q
        grid=(M // tm,),
        in_specs=[
            pl.BlockSpec((tm, D), lambda i: (i, 0)),
            pl.BlockSpec((D, D), lambda i: (0, 0)),
            pl.BlockSpec((1, D), lambda i: (0, 0)),
            pl.BlockSpec((tm, D), lambda i: (i, 0)),
            pl.BlockSpec((1, D), lambda i: (0, 0)),
            pl.BlockSpec((1, D), lambda i: (0, 0)),
            pl.BlockSpec((D, D), lambda i: (0, 0)),
            pl.BlockSpec((1, D), lambda i: (0, 0)),
        ],
        out_specs=(pl.BlockSpec((tm, D), lambda i: (i, 0)),
                   pl.BlockSpec((tm, D), lambda i: (i, 0))),
        compiler_params=_compiler_params(("parallel",)),
    )(ctx, w, b.reshape(1, D), resid, gamma.reshape(1, D), beta.reshape(1, D),
      wq, bq.reshape(1, D))


# ------------------- fused FFN (lin-ReLU-lin) + add + LayerNorm --------------

def _ffn_add_ln_kernel(x_ref, w1_ref, b1_ref, w2_ref, b2_ref, g_ref, bln_ref,
                       o_ref, acc_ref, *, eps):
    @pl.when(pl.program_id(1) == 0)
    def _():
        acc_ref[...] = jnp.zeros_like(acc_ref)

    h = jnp.dot(x_ref[...].astype(jnp.bfloat16), w1_ref[...],
                preferred_element_type=jnp.float32) + b1_ref[...]
    h = jnp.maximum(h, 0.0)
    acc_ref[...] += jnp.dot(h.astype(jnp.bfloat16), w2_ref[...],
                            preferred_element_type=jnp.float32)

    @pl.when(pl.program_id(1) == pl.num_programs(1) - 1)
    def _():
        hres = acc_ref[...] + b2_ref[...] + x_ref[...]   # residual (dropout=id)
        mu = jnp.mean(hres, axis=-1, keepdims=True)
        var = jnp.mean(jnp.square(hres - mu), axis=-1, keepdims=True)
        o_ref[...] = ((hres - mu) * jax.lax.rsqrt(var + eps) * g_ref[...]
                      + bln_ref[...])


def pallas_ffn_add_ln(x, w1, b1, w2, b2, gamma, beta, *, eps=1e-5,
                      tm=256, th=512):
    M, D = x.shape
    H = w1.shape[1]
    tm = _pick_tile(M, tm, align=8)
    th = _pick_tile(H, th, align=128)
    est = int(1.3 * (2 * tm * D * 4 + 2 * D * th * 2 + 2 * th * D * 2
                     + tm * D * 4 + tm * th * 4 + 2 * tm * D * 4))
    return pl.pallas_call(
        functools.partial(_ffn_add_ln_kernel, eps=eps),
        out_shape=jax.ShapeDtypeStruct((M, D), jnp.float32),
        grid=(M // tm, H // th),
        in_specs=[
            pl.BlockSpec((tm, D), lambda i, j: (i, 0)),
            pl.BlockSpec((D, th), lambda i, j: (0, j)),
            pl.BlockSpec((1, th), lambda i, j: (0, j)),
            pl.BlockSpec((th, D), lambda i, j: (j, 0)),
            pl.BlockSpec((1, D), lambda i, j: (0, 0)),
            pl.BlockSpec((1, D), lambda i, j: (0, 0)),
            pl.BlockSpec((1, D), lambda i, j: (0, 0)),
        ],
        out_specs=pl.BlockSpec((tm, D), lambda i, j: (i, 0)),
        scratch_shapes=[pltpu.VMEM((tm, D), jnp.float32)],
        compiler_params=_compiler_params(("parallel", "arbitrary"), est),
    )(x, w1, b1.reshape(1, H), w2, b2.reshape(1, D),
      gamma.reshape(1, D), beta.reshape(1, D))


# -------------------------- attention kernels --------------------------------
# Head-major layout: each grid step (b, h, q-tile) works on contiguous (L, Dh)
# tiles -> no in-kernel lane slicing / XLU relayouts, bounded VMEM per step.
# TODO(synk): for very long sequences also tile Lk with online-softmax scratch
# (flash-style) instead of loading the full K/V per (b, h) step.

def _self_attn_kernel(q_ref, k_ref, v_ref, m_ref, ctx_ref, *, scale):
    q = q_ref[0, 0, 0] * scale            # [tq, Dh] bf16 (scale folded into q)
    k = k_ref[0, 0, 0]                    # [Lk, Dh] bf16
    v = v_ref[0, 0, 0]                    # [Lk, Dh] bf16
    keep = m_ref[0] > 0.0                 # [1, Lk] key-padding mask
    s = jnp.dot(q, k.T, preferred_element_type=jnp.float32)
    # TODO(synk): key-padding mask only, no causal mask (matches the reference
    # DecoderBlockLayer which only passes dest_mask).
    s = jnp.where(keep, s, -1e9)
    s = s - jnp.max(s, axis=-1, keepdims=True)
    p = jnp.exp(s)
    p = p * pl.reciprocal(jnp.sum(p, axis=-1, keepdims=True), approx=True)
    ctx_ref[0, 0] = jnp.dot(p.astype(jnp.bfloat16), v,
                            preferred_element_type=jnp.float32
                            ).astype(ctx_ref.dtype)


def pallas_self_attention(qkvh, mask, *, tq_pref=256):
    """qkvh:[3,B,H,L,Dh] bf16, mask:[B,1,L] f32 -> ctx:[B,H,L,Dh] bf16."""
    _, B, H, L, Dh = qkvh.shape
    scale = 1.0 / math.sqrt(Dh)
    tq = _pick_tile(L, tq_pref, align=8)
    return pl.pallas_call(
        functools.partial(_self_attn_kernel, scale=scale),
        out_shape=jax.ShapeDtypeStruct((B, H, L, Dh), jnp.bfloat16),
        grid=(B, H, L // tq),
        in_specs=[
            pl.BlockSpec((1, 1, 1, tq, Dh), lambda b, h, qi: (0, b, h, qi, 0)),
            pl.BlockSpec((1, 1, 1, L, Dh), lambda b, h, qi: (1, b, h, 0, 0)),
            pl.BlockSpec((1, 1, 1, L, Dh), lambda b, h, qi: (2, b, h, 0, 0)),
            pl.BlockSpec((1, 1, L), lambda b, h, qi: (b, 0, 0)),
        ],
        out_specs=pl.BlockSpec((1, 1, tq, Dh), lambda b, h, qi: (b, h, qi, 0)),
        compiler_params=_compiler_params(("parallel", "parallel", "parallel")),
    )(qkvh, qkvh, qkvh, mask)


def _cross_attn_kernel(q_ref, k_ref, v_ref, m_ref, ctx_ref, attn_ref, *, scale):
    q = q_ref[0, 0] * scale               # [tq, Dh] bf16
    k = k_ref[0, 0, 0]                    # [Lk, Dh] bf16
    v = v_ref[0, 0, 0]
    keep = m_ref[0] > 0.0
    s = jnp.dot(q, k.T, preferred_element_type=jnp.float32)
    s = jnp.where(keep, s, -1e9)
    s = s - jnp.max(s, axis=-1, keepdims=True)
    p = jnp.exp(s)
    # Exact normalization: these probabilities are a module output.
    p = p / jnp.sum(p, axis=-1, keepdims=True)
    attn_ref[0, 0] = p.astype(attn_ref.dtype)   # stored per (b, h) grid step
    ctx_ref[0, 0] = jnp.dot(p.astype(jnp.bfloat16), v,
                            preferred_element_type=jnp.float32
                            ).astype(ctx_ref.dtype)


def pallas_cross_attention(qh, kvh, mask, *, attn_dtype=jnp.float32,
                           tq_pref=256):
    """qh:[B,H,Lq,Dh] bf16, kvh:[2,B,H,Lk,Dh] bf16, mask:[B,1,Lk] f32
       -> ctx:[B,H,Lq,Dh] bf16, attn:[B,H,Lq,Lk] attn_dtype."""
    B, H, Lq, Dh = qh.shape
    Lk = kvh.shape[3]
    scale = 1.0 / math.sqrt(Dh)
    tq = _pick_tile(Lq, tq_pref, align=8)
    return pl.pallas_call(
        functools.partial(_cross_attn_kernel, scale=scale),
        out_shape=(jax.ShapeDtypeStruct((B, H, Lq, Dh), jnp.bfloat16),
                   jax.ShapeDtypeStruct((B, H, Lq, Lk), attn_dtype)),
        grid=(B, H, Lq // tq),
        in_specs=[
            pl.BlockSpec((1, 1, tq, Dh), lambda b, h, qi: (b, h, qi, 0)),
            pl.BlockSpec((1, 1, 1, Lk, Dh), lambda b, h, qi: (0, b, h, 0, 0)),
            pl.BlockSpec((1, 1, 1, Lk, Dh), lambda b, h, qi: (1, b, h, 0, 0)),
            pl.BlockSpec((1, 1, Lk), lambda b, h, qi: (b, 0, 0)),
        ],
        out_specs=(pl.BlockSpec((1, 1, tq, Dh), lambda b, h, qi: (b, h, qi, 0)),
                   pl.BlockSpec((1, 1, tq, Lk), lambda b, h, qi: (b, h, qi, 0))),
        compiler_params=_compiler_params(("parallel", "parallel", "parallel")),
    )(qh, kvh, kvh, mask)


# --------------------------- model-level wrapper -----------------------------

def decoder_block_forward(params, dest_inputs, src_encoded, dest_mask, src_mask,
                          n_heads):
    B, Ld, D = dest_inputs.shape
    Ls = src_encoded.shape[1]
    H = n_heads
    Dh = D // H
    dest_flat = dest_inputs.reshape(B * Ld, D)
    src_flat = src_encoded.reshape(B * Ls, D)
    dmask = dest_mask.reshape(B, 1, Ld).astype(jnp.float32)
    smask = src_mask.reshape(B, 1, Ls).astype(jnp.float32)

    # 1) fused QKV projection (bf16 activations between kernels)
    sa = params["self_attn"]
    qkv = pallas_linear(dest_flat, sa["w_qkv"], sa["b_qkv"])       # [B*Ld,3D] bf16
    # head-major layout: contiguous (L, Dh) tiles per (batch, head) grid step
    qkvh = qkv.reshape(B, Ld, 3, H, Dh).transpose(2, 0, 3, 1, 4)   # [3,B,H,Ld,Dh]

    # 2) masked self-attention (probs never touch HBM)
    ctx_self = pallas_self_attention(qkvh, dmask)                  # [B,H,Ld,Dh] bf16
    ctx_self_flat = ctx_self.transpose(0, 2, 1, 3).reshape(B * Ld, D)

    # 3) out-proj + residual + LayerNorm, fused with the cross-attn Q projection
    ca = params["cross_attn"]
    masked_context, q_cross = pallas_proj_add_ln_q(
        ctx_self_flat, sa["w_o"], sa["b_o"], dest_flat,
        params["ln1_g"], params["ln1_b"], ca["w_q"], ca["b_q"])

    # 4) cross-attention KV projection over the encoder output
    kv = pallas_linear(src_flat, ca["w_kv"], ca["b_kv"])           # [B*Ls,2D] bf16
    kvh = kv.reshape(B, Ls, 2, H, Dh).transpose(2, 0, 3, 1, 4)     # [2,B,H,Ls,Dh]
    qh = q_cross.reshape(B, Ld, H, Dh).transpose(0, 2, 1, 3)       # [B,H,Ld,Dh]

    # 5) cross-attention (emits attention weights)
    ctx_cross, attn_w = pallas_cross_attention(qh, kvh, smask)
    ctx_cross_flat = ctx_cross.transpose(0, 2, 1, 3).reshape(B * Ld, D)

    # 6) out-proj + residual + LayerNorm
    context = pallas_proj_add_ln(
        ctx_cross_flat, ca["w_o"], ca["b_o"], masked_context,
        params["ln2_g"], params["ln2_b"])

    # 7) FFN (hidden dim tiled) + residual + LayerNorm (fully fused)
    outputs = pallas_ffn_add_ln(
        context, params["ff_w1"], params["ff_b1"],
        params["ff_w2"], params["ff_b2"],
        params["ln3_g"], params["ln3_b"])

    return outputs.reshape(B, Ld, D), attn_w


def init_params(key, d_model, hidden_size):
    wdt = jnp.bfloat16  # weights stored bf16 for the MXU; biases/LN stay f32

    def lin(k, din, dout):
        w = (jax.random.normal(k, (din, dout), jnp.float32) * 0.02).astype(wdt)
        return w, jnp.zeros((dout,), jnp.float32)

    ks = jax.random.split(key, 7)
    w_qkv, b_qkv = lin(ks[0], d_model, 3 * d_model)     # fused self-attn QKV
    w_o_s, b_o_s = lin(ks[1], d_model, d_model)
    w_q, b_q = lin(ks[2], d_model, d_model)             # cross-attn Q
    w_kv, b_kv = lin(ks[3], d_model, 2 * d_model)       # fused cross-attn KV
    w_o_c, b_o_c = lin(ks[4], d_model, d_model)
    ff_w1, ff_b1 = lin(ks[5], d_model, hidden_size)
    ff_w2, ff_b2 = lin(ks[6], hidden_size, d_model)
    ones = jnp.ones((d_model,), jnp.float32)
    zeros = jnp.zeros((d_model,), jnp.float32)
    return dict(
        self_attn=dict(w_qkv=w_qkv, b_qkv=b_qkv, w_o=w_o_s, b_o=b_o_s),
        cross_attn=dict(w_q=w_q, b_q=b_q, w_kv=w_kv, b_kv=b_kv,
                        w_o=w_o_c, b_o=b_o_c),
        ln1_g=ones, ln1_b=zeros,
        ln2_g=ones, ln2_b=zeros,
        ln3_g=ones, ln3_b=zeros,
        ff_w1=ff_w1, ff_b1=ff_b1, ff_w2=ff_w2, ff_b2=ff_b2,
    )


if __name__ == "__main__":
    d_model, n_heads, hidden_size = 32, 4, 64
    B, dest_len, src_len = 2, 8, 8

    key = jax.random.PRNGKey(0)
    kp, kd, ks = jax.random.split(key, 3)
    params = init_params(kp, d_model, hidden_size)

    dest_inputs = jax.random.normal(kd, (B, dest_len, d_model), jnp.float32)
    src_encoded = jax.random.normal(ks, (B, src_len, d_model), jnp.float32)
    dest_mask = jnp.ones((B, dest_len), jnp.float32)
    src_mask = jnp.ones((B, src_len), jnp.float32).at[1, -2:].set(0.0)

    fwd = jax.jit(functools.partial(decoder_block_forward, n_heads=n_heads))
    outputs, attn_weights = fwd(params, dest_inputs, src_encoded,
                                dest_mask, src_mask)
    jax.block_until_ready((outputs, attn_weights))

    assert outputs.shape == (B, dest_len, d_model)
    assert attn_weights.shape == (B, n_heads, dest_len, src_len)
    assert bool(jnp.all(jnp.isfinite(outputs)))
    assert bool(jnp.all(jnp.isfinite(attn_weights)))
    # attention rows over the masked source should (almost exactly) sum to 1
    assert bool(jnp.all(jnp.abs(jnp.sum(attn_weights, axis=-1) - 1.0) < 1e-3))
    print("KERNEL_OK")
</pallas_src>

<mosaic_0001>
module attributes {stable_mosaic.version = 11 : i64} {
  func.func @_self_attn_kernel(%arg0: i32, %arg1: i32, %arg2: i32, %arg3: memref<1x1x1x8x8xbf16, #tpu.memory_space<vmem>>, %arg4: memref<1x1x1x8x8xbf16, #tpu.memory_space<vmem>>, %arg5: memref<1x1x1x8x8xbf16, #tpu.memory_space<vmem>>, %arg6: memref<1x1x8xf32, #tpu.memory_space<vmem>>, %arg7: memref<1x1x8x8xbf16, #tpu.memory_space<vmem>>) attributes {dimension_semantics = [#tpu.dimension_semantics<parallel>, #tpu.dimension_semantics<parallel>, #tpu.dimension_semantics<parallel>], iteration_bounds = array<i64: 2, 4, 1>, scalar_prefetch = 0 : i64, scratch_operands = 0 : i64, tpu.core_type = #tpu.core_type<tc>, window_params = [{transform_indices = @transform_0, window_bounds = array<i64: 1, 1, 1, 8, 8>}, {transform_indices = @transform_1, window_bounds = array<i64: 1, 1, 1, 8, 8>}, {transform_indices = @transform_2, window_bounds = array<i64: 1, 1, 1, 8, 8>}, {transform_indices = @transform_3, window_bounds = array<i64: 1, 1, 8>}, {transform_indices = @transform_4, window_bounds = array<i64: 1, 1, 8, 8>}]} {
    %c0 = arith.constant 0 : index
    %c0_0 = arith.constant 0 : index
    %c0_1 = arith.constant 0 : index
    %c0_2 = arith.constant 0 : index
    %c0_3 = arith.constant 0 : index
    %0 = vector.load %arg3[%c0, %c0_0, %c0_1, %c0_2, %c0_3] : memref<1x1x1x8x8xbf16, #tpu.memory_space<vmem>>, vector<1x1x1x8x8xbf16>
    %1 = vector.shape_cast %0 : vector<1x1x1x8x8xbf16> to vector<8x8xbf16>
    %cst = arith.constant 3.535160e-01 : bf16
    %2 = vector.broadcast %cst : bf16 to vector<8x8xbf16>
    %3 = arith.mulf %1, %2 : vector<8x8xbf16>
    %c0_4 = arith.constant 0 : index
    %c0_5 = arith.constant 0 : index
    %c0_6 = arith.constant 0 : index
    %c0_7 = arith.constant 0 : index
    %c0_8 = arith.constant 0 : index
    %4 = vector.load %arg4[%c0_4, %c0_5, %c0_6, %c0_7, %c0_8] : memref<1x1x1x8x8xbf16, #tpu.memory_space<vmem>>, vector<1x1x1x8x8xbf16>
    %5 = vector.shape_cast %4 : vector<1x1x1x8x8xbf16> to vector<8x8xbf16>
    %c0_9 = arith.constant 0 : index
    %c0_10 = arith.constant 0 : index
    %c0_11 = arith.constant 0 : index
    %c0_12 = arith.constant 0 : index
    %c0_13 = arith.constant 0 : index
    %6 = vector.load %arg5[%c0_9, %c0_10, %c0_11, %c0_12, %c0_13] : memref<1x1x1x8x8xbf16, #tpu.memory_space<vmem>>, vector<1x1x1x8x8xbf16>
    %7 = vector.shape_cast %6 : vector<1x1x1x8x8xbf16> to vector<8x8xbf16>
    %c0_14 = arith.constant 0 : index
    %c0_15 = arith.constant 0 : index
    %c0_16 = arith.constant 0 : index
    %8 = vector.load %arg6[%c0_14, %c0_15, %c0_16] : memref<1x1x8xf32, #tpu.memory_space<vmem>>, vector<1x1x8xf32>
    %9 = vector.shape_cast %8 : vector<1x1x8xf32> to vector<1x8xf32>
    %cst_17 = arith.constant 0.000000e+00 : f32
    %10 = vector.broadcast %cst_17 : f32 to vector<1x8xf32>
    %11 = arith.cmpf ogt, %9, %10 : vector<1x8xf32>
    %12 = tpu.transpose %5, [1, 0] : vector<8x8xbf16> -> vector<8x8xbf16>
    %cst_18 = arith.constant dense<0.000000e+00> : vector<8x8xf32>
    %13 = tpu.matmul %3, %12, %cst_18 {dimension_numbers = #tpu.dot_dimension_numbers<[1], [0], [0], [1], [0, 0, 1, 1], [], []>} : vector<8x8xbf16>, vector<8x8xbf16>, vector<8x8xf32> -> vector<8x8xf32>
    %cst_19 = arith.constant -1.000000e+09 : f32
    %14 = vector.shape_cast %11 : vector<1x8xi1> to vector<1x8xi1>
    %15 = vector.broadcast %14 : vector<1x8xi1> to vector<8x8xi1>
    %16 = vector.broadcast %cst_19 : f32 to vector<8x8xf32>
    %17 = arith.select %15, %13, %16 : vector<8x8xi1>, vector<8x8xf32>
    %cst_20 = arith.constant dense<0xFF800000> : vector<8xf32>
    %18 = vector.multi_reduction <maximumf>, %17, %cst_20 [1] : vector<8x8xf32> to vector<8xf32>
    %19 = vector.shape_cast %18 : vector<8xf32> to vector<8x1xf32>
    %20 = vector.broadcast %19 : vector<8x1xf32> to vector<8x8xf32>
    %21 = arith.subf %17, %20 : vector<8x8xf32>
    %22 = math.exp %21 : vector<8x8xf32>
    %cst_21 = arith.constant dense<0.000000e+00> : vector<8xf32>
    %23 = vector.multi_reduction <add>, %22, %cst_21 [1] : vector<8x8xf32> to vector<8xf32>
    %24 = vector.shape_cast %23 : vector<8xf32> to vector<8x1xf32>
    %25 = tpu.reciprocal %24 {approx = true} : vector<8x1xf32> -> vector<8x1xf32>
    %26 = vector.broadcast %25 : vector<8x1xf32> to vector<8x8xf32>
    %27 = arith.mulf %22, %26 : vector<8x8xf32>
    %28 = arith.truncf %27 : vector<8x8xf32> to vector<8x8xbf16>
    %cst_22 = arith.constant dense<0.000000e+00> : vector<8x8xf32>
    %29 = tpu.matmul %28, %7, %cst_22 {dimension_numbers = #tpu.dot_dimension_numbers<[1], [0], [0], [1], [0, 0, 1, 1], [], []>} : vector<8x8xbf16>, vector<8x8xbf16>, vector<8x8xf32> -> vector<8x8xf32>
    %30 = arith.truncf %29 : vector<8x8xf32> to vector<8x8xbf16>
    %c0_23 = arith.constant 0 : index
    %c0_24 = arith.constant 0 : index
    %c0_25 = arith.constant 0 : index
    %c0_26 = arith.constant 0 : index
    %31 = vector.load %arg7[%c0_23, %c0_24, %c0_25, %c0_26] : memref<1x1x8x8xbf16, #tpu.memory_space<vmem>>, vector<1x1x8x8xbf16>
    %32 = vector.shape_cast %31 : vector<1x1x8x8xbf16> to vector<8x8xbf16>
    %33 = vector.shape_cast %30 : vector<8x8xbf16> to vector<1x1x8x8xbf16>
    tpu.vector_store %arg7[%c0_23, %c0_24, %c0_25, %c0_26], %33 {strides = array<i32>} : memref<1x1x8x8xbf16, #tpu.memory_space<vmem>>, vector<1x1x8x8xbf16>,
    return
  }
  func.func @transform_0(%arg0: i32, %arg1: i32, %arg2: i32) -> (i32, i32, i32, i32, i32) {
    %c0_i32 = arith.constant 0 : i32
    %c0_i32_0 = arith.constant 0 : i32
    %c0_i32_1 = arith.constant 0 : i32
    return %c0_i32, %arg0, %arg1, %arg2, %c0_i32_0 : i32, i32, i32, i32, i32
  }
  func.func @transform_1(%arg0: i32, %arg1: i32, %arg2: i32) -> (i32, i32, i32, i32, i32) {
    %c1_i32 = arith.constant 1 : i32
    %c0_i32 = arith.constant 0 : i32
    %c0_i32_0 = arith.constant 0 : i32
    %c0_i32_1 = arith.constant 0 : i32
    return %c1_i32, %arg0, %arg1, %c0_i32, %c0_i32_0 : i32, i32, i32, i32, i32
  }
  func.func @transform_2(%arg0: i32, %arg1: i32, %arg2: i32) -> (i32, i32, i32, i32, i32) {
    %c2_i32 = arith.constant 2 : i32
    %c0_i32 = arith.constant 0 : i32
    %c0_i32_0 = arith.constant 0 : i32
    %c0_i32_1 = arith.constant 0 : i32
    return %c2_i32, %arg0, %arg1, %c0_i32, %c0_i32_0 : i32, i32, i32, i32, i32
  }
  func.func @transform_3(%arg0: i32, %arg1: i32, %arg2: i32) -> (i32, i32, i32) {
    %c0_i32 = arith.constant 0 : i32
    %c0_i32_0 = arith.constant 0 : i32
    %c0_i32_1 = arith.constant 0 : i32
    return %arg0, %c0_i32, %c0_i32_0 : i32, i32, i32
  }
  func.func @transform_4(%arg0: i32, %arg1: i32, %arg2: i32) -> (i32, i32, i32, i32) {
    %c0_i32 = arith.constant 0 : i32
    %c0_i32_0 = arith.constant 0 : i32
    return %arg0, %arg1, %arg2, %c0_i32 : i32, i32, i32, i32
  }
}

module attributes {stable_mosaic.version = 11 : i64} {
  func.func @_linear_kernel(%arg0: i32, %arg1: i32, %arg2: i32, %arg3: memref<16x32xf32, #tpu.memory_space<vmem>>, %arg4: memref<32x96xbf16, #tpu.memory_space<vmem>>, %arg5: memref<1x96xf32, #tpu.memory_space<vmem>>, %arg6: memref<16x96xbf16, #tpu.memory_space<vmem>>, %arg7: memref<16x96xf32, #tpu.memory_space<vmem>>) attributes {dimension_semantics = [#tpu.dimension_semantics<parallel>, #tpu.dimension_semantics<parallel>, #tpu.dimension_semantics<arbitrary>], iteration_bounds = array<i64: 1, 1, 1>, scalar_prefetch = 0 : i64, scratch_operands = 1 : i64, tpu.core_type = #tpu.core_type<tc>, window_params = [{transform_indices = @transform_0, window_bounds = array<i64: 16, 32>}, {transform_indices = @transform_1, window_bounds = array<i64: 32, 96>}, {transform_indices = @transform_2, window_bounds = array<i64: 1, 96>}, {transform_indices = @transform_3, window_bounds = array<i64: 16, 96>}]} {
    %c0_i32 = arith.constant 0 : i32
    %0 = arith.cmpi eq, %arg2, %c0_i32 : i32
    %1 = arith.extui %0 : i1 to i32
    %c0_i32_0 = arith.constant 0 : i32
    %2 = arith.cmpi ne, %1, %c0_i32_0 : i32
    scf.if %2 {
      %cst_10 = arith.constant 0.000000e+00 : f32
      %13 = vector.broadcast %cst_10 : f32 to vector<16x96xf32>
      %c0_11 = arith.constant 0 : index
      %c0_12 = arith.constant 0 : index
      %14 = vector.load %arg7[%c0_11, %c0_12] : memref<16x96xf32, #tpu.memory_space<vmem>>, vector<16x96xf32>
      tpu.vector_store %arg7[%c0_11, %c0_12], %13 {strides = array<i32>} : memref<16x96xf32, #tpu.memory_space<vmem>>, vector<16x96xf32>,
    } else {
    }
    %c0 = arith.constant 0 : index
    %c0_1 = arith.constant 0 : index
    %3 = vector.load %arg7[%c0, %c0_1] : memref<16x96xf32, #tpu.memory_space<vmem>>, vector<16x96xf32>
    %c0_2 = arith.constant 0 : index
    %c0_3 = arith.constant 0 : index
    %4 = vector.load %arg3[%c0_2, %c0_3] : memref<16x32xf32, #tpu.memory_space<vmem>>, vector<16x32xf32>
    %5 = arith.truncf %4 : vector<16x32xf32> to vector<16x32xbf16>
    %c0_4 = arith.constant 0 : index
    %c0_5 = arith.constant 0 : index
    %6 = vector.load %arg4[%c0_4, %c0_5] : memref<32x96xbf16, #tpu.memory_space<vmem>>, vector<32x96xbf16>
    %cst = arith.constant dense<0.000000e+00> : vector<16x96xf32>
    %7 = tpu.matmul %5, %6, %cst {dimension_numbers = #tpu.dot_dimension_numbers<[1], [0], [0], [1], [0, 0, 1, 1], [], []>} : vector<16x32xbf16>, vector<32x96xbf16>, vector<16x96xf32> -> vector<16x96xf32>
    %8 = arith.addf %3, %7 : vector<16x96xf32>
    %c0_6 = arith.constant 0 : index
    %c0_7 = arith.constant 0 : index
    %9 = vector.load %arg7[%c0_6, %c0_7] : memref<16x96xf32, #tpu.memory_space<vmem>>, vector<16x96xf32>
    tpu.vector_store %arg7[%c0_6, %c0_7], %8 {strides = array<i32>} : memref<16x96xf32, #tpu.memory_space<vmem>>, vector<16x96xf32>,
    %c0_i32_8 = arith.constant 0 : i32
    %10 = arith.cmpi eq, %arg2, %c0_i32_8 : i32
    %11 = arith.extui %10 : i1 to i32
    %c0_i32_9 = arith.constant 0 : i32
    %12 = arith.cmpi ne, %11, %c0_i32_9 : i32
    scf.if %12 {
      %c0_10 = arith.constant 0 : index
      %c0_11 = arith.constant 0 : index
      %13 = vector.load %arg7[%c0_10, %c0_11] : memref<16x96xf32, #tpu.memory_space<vmem>>, vector<16x96xf32>
      %c0_12 = arith.constant 0 : index
      %c0_13 = arith.constant 0 : index
      %14 = vector.load %arg5[%c0_12, %c0_13] : memref<1x96xf32, #tpu.memory_space<vmem>>, vector<1x96xf32>
      %15 = vector.broadcast %14 : vector<1x96xf32> to vector<16x96xf32>
      %16 = arith.addf %13, %15 : vector<16x96xf32>
      %17 = arith.truncf %16 : vector<16x96xf32> to vector<16x96xbf16>
      %c0_14 = arith.constant 0 : index
      %c0_15 = arith.constant 0 : index
      %18 = vector.load %arg6[%c0_14, %c0_15] : memref<16x96xbf16, #tpu.memory_space<vmem>>, vector<16x96xbf16>
      tpu.vector_store %arg6[%c0_14, %c0_15], %17 {strides = array<i32>} : memref<16x96xbf16, #tpu.memory_space<vmem>>, vector<16x96xbf16>,
    } else {
    }
    return
  }
  func.func @transform_0(%arg0: i32, %arg1: i32, %arg2: i32) -> (i32, i32) {
    %c0_i32 = arith.constant 0 : i32
    return %arg0, %arg2 : i32, i32
  }
  func.func @transform_1(%arg0: i32, %arg1: i32, %arg2: i32) -> (i32, i32) {
    %c0_i32 = arith.constant 0 : i32
    return %arg2, %arg1 : i32, i32
  }
  func.func @transform_2(%arg0: i32, %arg1: i32, %arg2: i32) -> (i32, i32) {
    %c0_i32 = arith.constant 0 : i32
    %c0_i32_0 = arith.constant 0 : i32
    return %c0_i32, %arg1 : i32, i32
  }
  func.func @transform_3(%arg0: i32, %arg1: i32, %arg2: i32) -> (i32, i32) {
    %c0_i32 = arith.constant 0 : i32
    return %arg0, %arg1 : i32, i32
  }
}

module attributes {stable_mosaic.version = 11 : i64} {
  func.func @_proj_add_ln_q_kernel(%arg0: i32, %arg1: memref<16x32xbf16, #tpu.memory_space<vmem>>, %arg2: memref<32x32xbf16, #tpu.memory_space<vmem>>, %arg3: memref<1x32xf32, #tpu.memory_space<vmem>>, %arg4: memref<16x32xf32, #tpu.memory_space<vmem>>, %arg5: memref<1x32xf32, #tpu.memory_space<vmem>>, %arg6: memref<1x32xf32, #tpu.memory_space<vmem>>, %arg7: memref<32x32xbf16, #tpu.memory_space<vmem>>, %arg8: memref<1x32xf32, #tpu.memory_space<vmem>>, %arg9: memref<16x32xf32, #tpu.memory_space<vmem>>, %arg10: memref<16x32xbf16, #tpu.memory_space<vmem>>) attributes {dimension_semantics = [#tpu.dimension_semantics<parallel>], iteration_bounds = array<i64: 1>, scalar_prefetch = 0 : i64, scratch_operands = 0 : i64, tpu.core_type = #tpu.core_type<tc>, window_params = [{transform_indices = @transform_0, window_bounds = array<i64: 16, 32>}, {pipeline_mode = #tpu.pipeline_mode<synchronous>, transform_indices = @transform_1, window_bounds = array<i64: 32, 32>}, {pipeline_mode = #tpu.pipeline_mode<synchronous>, transform_indices = @transform_2, window_bounds = array<i64: 1, 32>}, {transform_indices = @transform_3, window_bounds = array<i64: 16, 32>}, {pipeline_mode = #tpu.pipeline_mode<synchronous>, transform_indices = @transform_4, window_bounds = array<i64: 1, 32>}, {pipeline_mode = #tpu.pipeline_mode<synchronous>, transform_indices = @transform_5, window_bounds = array<i64: 1, 32>}, {pipeline_mode = #tpu.pipeline_mode<synchronous>, transform_indices = @transform_6, window_bounds = array<i64: 32, 32>}, {pipeline_mode = #tpu.pipeline_mode<synchronous>, transform_indices = @transform_7, window_bounds = array<i64: 1, 32>}, {transform_indices = @transform_8, window_bounds = array<i64: 16, 32>}, {transform_indices = @transform_9, window_bounds = array<i64: 16, 32>}]} {
    %c0 = arith.constant 0 : index
    %c0_0 = arith.constant 0 : index
    %0 = vector.load %arg1[%c0, %c0_0] : memref<16x32xbf16, #tpu.memory_space<vmem>>, vector<16x32xbf16>
    %c0_1 = arith.constant 0 : index
    %c0_2 = arith.constant 0 : index
    %1 = vector.load %arg2[%c0_1, %c0_2] : memref<32x32xbf16, #tpu.memory_space<vmem>>, vector<32x32xbf16>
    %cst = arith.constant dense<0.000000e+00> : vector<16x32xf32>
    %2 = tpu.matmul %0, %1, %cst {dimension_numbers = #tpu.dot_dimension_numbers<[1], [0], [0], [1], [0, 0, 1, 1], [], []>} : vector<16x32xbf16>, vector<32x32xbf16>, vector<16x32xf32> -> vector<16x32xf32>
    %c0_3 = arith.constant 0 : index
    %c0_4 = arith.constant 0 : index
    %3 = vector.load %arg3[%c0_3, %c0_4] : memref<1x32xf32, #tpu.memory_space<vmem>>, vector<1x32xf32>
    %4 = vector.broadcast %3 : vector<1x32xf32> to vector<16x32xf32>
    %5 = arith.addf %2, %4 : vector<16x32xf32>
    %c0_5 = arith.constant 0 : index
    %c0_6 = arith.constant 0 : index
    %6 = vector.load %arg4[%c0_5, %c0_6] : memref<16x32xf32, #tpu.memory_space<vmem>>, vector<16x32xf32>
    %7 = arith.addf %5, %6 : vector<16x32xf32>
    %cst_7 = arith.constant dense<0.000000e+00> : vector<16xf32>
    %8 = vector.multi_reduction <add>, %7, %cst_7 [1] : vector<16x32xf32> to vector<16xf32>
    %9 = vector.shape_cast %8 : vector<16xf32> to vector<16x1xf32>
    %cst_8 = arith.constant 3.200000e+01 : f32
    %10 = vector.broadcast %cst_8 : f32 to vector<16x1xf32>
    %11 = arith.divf %9, %10 : vector<16x1xf32>
    %12 = vector.broadcast %11 : vector<16x1xf32> to vector<16x32xf32>
    %13 = arith.subf %7, %12 : vector<16x32xf32>
    %14 = arith.mulf %13, %13 : vector<16x32xf32>
    %cst_9 = arith.constant dense<0.000000e+00> : vector<16xf32>
    %15 = vector.multi_reduction <add>, %14, %cst_9 [1] : vector<16x32xf32> to vector<16xf32>
    %16 = vector.shape_cast %15 : vector<16xf32> to vector<16x1xf32>
    %cst_10 = arith.constant 3.200000e+01 : f32
    %17 = vector.broadcast %cst_10 : f32 to vector<16x1xf32>
    %18 = arith.divf %16, %17 : vector<16x1xf32>
    %19 = vector.broadcast %11 : vector<16x1xf32> to vector<16x32xf32>
    %20 = arith.subf %7, %19 : vector<16x32xf32>
    %cst_11 = arith.constant 9.99999974E-6 : f32
    %21 = vector.broadcast %cst_11 : f32 to vector<16x1xf32>
    %22 = arith.addf %18, %21 : vector<16x1xf32>
    %23 = math.rsqrt %22 : vector<16x1xf32>
    %24 = vector.broadcast %23 : vector<16x1xf32> to vector<16x32xf32>
    %25 = arith.mulf %20, %24 : vector<16x32xf32>
    %c0_12 = arith.constant 0 : index
    %c0_13 = arith.constant 0 : index
    %26 = vector.load %arg5[%c0_12, %c0_13] : memref<1x32xf32, #tpu.memory_space<vmem>>, vector<1x32xf32>
    %27 = vector.broadcast %26 : vector<1x32xf32> to vector<16x32xf32>
    %28 = arith.mulf %25, %27 : vector<16x32xf32>
    %c0_14 = arith.constant 0 : index
    %c0_15 = arith.constant 0 : index
    %29 = vector.load %arg6[%c0_14, %c0_15] : memref<1x32xf32, #tpu.memory_space<vmem>>, vector<1x32xf32>
    %30 = vector.broadcast %29 : vector<1x32xf32> to vector<16x32xf32>
    %31 = arith.addf %28, %30 : vector<16x32xf32>
    %c0_16 = arith.constant 0 : index
    %c0_17 = arith.constant 0 : index
    %32 = vector.load %arg9[%c0_16, %c0_17] : memref<16x32xf32, #tpu.memory_space<vmem>>, vector<16x32xf32>
    tpu.vector_store %arg9[%c0_16, %c0_17], %31 {strides = array<i32>} : memref<16x32xf32, #tpu.memory_space<vmem>>, vector<16x32xf32>,
    %33 = arith.truncf %31 : vector<16x32xf32> to vector<16x32xbf16>
    %c0_18 = arith.constant 0 : index
    %c0_19 = arith.constant 0 : index
    %34 = vector.load %arg7[%c0_18, %c0_19] : memref<32x32xbf16, #tpu.memory_space<vmem>>, vector<32x32xbf16>
    %cst_20 = arith.constant dense<0.000000e+00> : vector<16x32xf32>
    %35 = tpu.matmul %33, %34, %cst_20 {dimension_numbers = #tpu.dot_dimension_numbers<[1], [0], [0], [1], [0, 0, 1, 1], [], []>} : vector<16x32xbf16>, vector<32x32xbf16>, vector<16x32xf32> -> vector<16x32xf32>
    %c0_21 = arith.constant 0 : index
    %c0_22 = arith.constant 0 : index
    %36 = vector.load %arg8[%c0_21, %c0_22] : memref<1x32xf32, #tpu.memory_space<vmem>>, vector<1x32xf32>
    %37 = vector.broadcast %36 : vector<1x32xf32> to vector<16x32xf32>
    %38 = arith.addf %35, %37 : vector<16x32xf32>
    %39 = arith.truncf %38 : vector<16x32xf32> to vector<16x32xbf16>
    %c0_23 = arith.constant 0 : index
    %c0_24 = arith.constant 0 : index
    %40 = vector.load %arg10[%c0_23, %c0_24] : memref<16x32xbf16, #tpu.memory_space<vmem>>, vector<16x32xbf16>
    tpu.vector_store %arg10[%c0_23, %c0_24], %39 {strides = array<i32>} : memref<16x32xbf16, #tpu.memory_space<vmem>>, vector<16x32xbf16>,
    return
  }
  func.func @transform_0(%arg0: i32) -> (i32, i32) {
    %c0_i32 = arith.constant 0 : i32
    %c0_i32_0 = arith.constant 0 : i32
    return %arg0, %c0_i32 : i32, i32
  }
  func.func @transform_1(%arg0: i32) -> (i32, i32) {
    %c0_i32 = arith.constant 0 : i32
    %c0_i32_0 = arith.constant 0 : i32
    %c0_i32_1 = arith.constant 0 : i32
    return %c0_i32, %c0_i32_0 : i32, i32
  }
  func.func @transform_2(%arg0: i32) -> (i32, i32) {
    %c0_i32 = arith.constant 0 : i32
    %c0_i32_0 = arith.constant 0 : i32
    %c0_i32_1 = arith.constant 0 : i32
    return %c0_i32, %c0_i32_0 : i32, i32
  }
  func.func @transform_3(%arg0: i32) -> (i32, i32) {
    %c0_i32 = arith.constant 0 : i32
    %c0_i32_0 = arith.constant 0 : i32
    return %arg0, %c0_i32 : i32, i32
  }
  func.func @transform_4(%arg0: i32) -> (i32, i32) {
    %c0_i32 = arith.constant 0 : i32
    %c0_i32_0 = arith.constant 0 : i32
    %c0_i32_1 = arith.constant 0 : i32
    return %c0_i32, %c0_i32_0 : i32, i32
  }
  func.func @transform_5(%arg0: i32) -> (i32, i32) {
    %c0_i32 = arith.constant 0 : i32
    %c0_i32_0 = arith.constant 0 : i32
    %c0_i32_1 = arith.constant 0 : i32
    return %c0_i32, %c0_i32_0 : i32, i32
  }
  func.func @transform_6(%arg0: i32) -> (i32, i32) {
    %c0_i32 = arith.constant 0 : i32
    %c0_i32_0 = arith.constant 0 : i32
    %c0_i32_1 = arith.constant 0 : i32
    return %c0_i32, %c0_i32_0 : i32, i32
  }
  func.func @transform_7(%arg0: i32) -> (i32, i32) {
    %c0_i32 = arith.constant 0 : i32
    %c0_i32_0 = arith.constant 0 : i32
    %c0_i32_1 = arith.constant 0 : i32
    return %c0_i32, %c0_i32_0 : i32, i32
  }
  func.func @transform_8(%arg0: i32) -> (i32, i32) {
    %c0_i32 = arith.constant 0 : i32
    %c0_i32_0 = arith.constant 0 : i32
    return %arg0, %c0_i32 : i32, i32
  }
  func.func @transform_9(%arg0: i32) -> (i32, i32) {
    %c0_i32 = arith.constant 0 : i32
    %c0_i32_0 = arith.constant 0 : i32
    return %arg0, %c0_i32 : i32, i32
  }
}

module attributes {stable_mosaic.version = 11 : i64} {
  func.func @_linear_kernel(%arg0: i32, %arg1: i32, %arg2: i32, %arg3: memref<16x32xf32, #tpu.memory_space<vmem>>, %arg4: memref<32x64xbf16, #tpu.memory_space<vmem>>, %arg5: memref<1x64xf32, #tpu.memory_space<vmem>>, %arg6: memref<16x64xbf16, #tpu.memory_space<vmem>>, %arg7: memref<16x64xf32, #tpu.memory_space<vmem>>) attributes {dimension_semantics = [#tpu.dimension_semantics<parallel>, #tpu.dimension_semantics<parallel>, #tpu.dimension_semantics<arbitrary>], iteration_bounds = array<i64: 1, 1, 1>, scalar_prefetch = 0 : i64, scratch_operands = 1 : i64, tpu.core_type = #tpu.core_type<tc>, window_params = [{transform_indices = @transform_0, window_bounds = array<i64: 16, 32>}, {transform_indices = @transform_1, window_bounds = array<i64: 32, 64>}, {transform_indices = @transform_2, window_bounds = array<i64: 1, 64>}, {transform_indices = @transform_3, window_bounds = array<i64: 16, 64>}]} {
    %c0_i32 = arith.constant 0 : i32
    %0 = arith.cmpi eq, %arg2, %c0_i32 : i32
    %1 = arith.extui %0 : i1 to i32
    %c0_i32_0 = arith.constant 0 : i32
    %2 = arith.cmpi ne, %1, %c0_i32_0 : i32
    scf.if %2 {
      %cst_10 = arith.constant 0.000000e+00 : f32
      %13 = vector.broadcast %cst_10 : f32 to vector<16x64xf32>
      %c0_11 = arith.constant 0 : index
      %c0_12 = arith.constant 0 : index
      %14 = vector.load %arg7[%c0_11, %c0_12] : memref<16x64xf32, #tpu.memory_space<vmem>>, vector<16x64xf32>
      tpu.vector_store %arg7[%c0_11, %c0_12], %13 {strides = array<i32>} : memref<16x64xf32, #tpu.memory_space<vmem>>, vector<16x64xf32>,
    } else {
    }
    %c0 = arith.constant 0 : index
    %c0_1 = arith.constant 0 : index
    %3 = vector.load %arg7[%c0, %c0_1] : memref<16x64xf32, #tpu.memory_space<vmem>>, vector<16x64xf32>
    %c0_2 = arith.constant 0 : index
    %c0_3 = arith.constant 0 : index
    %4 = vector.load %arg3[%c0_2, %c0_3] : memref<16x32xf32, #tpu.memory_space<vmem>>, vector<16x32xf32>
    %5 = arith.truncf %4 : vector<16x32xf32> to vector<16x32xbf16>
    %c0_4 = arith.constant 0 : index
    %c0_5 = arith.constant 0 : index
    %6 = vector.load %arg4[%c0_4, %c0_5] : memref<32x64xbf16, #tpu.memory_space<vmem>>, vector<32x64xbf16>
    %cst = arith.constant dense<0.000000e+00> : vector<16x64xf32>
    %7 = tpu.matmul %5, %6, %cst {dimension_numbers = #tpu.dot_dimension_numbers<[1], [0], [0], [1], [0, 0, 1, 1], [], []>} : vector<16x32xbf16>, vector<32x64xbf16>, vector<16x64xf32> -> vector<16x64xf32>
    %8 = arith.addf %3, %7 : vector<16x64xf32>
    %c0_6 = arith.constant 0 : index
    %c0_7 = arith.constant 0 : index
    %9 = vector.load %arg7[%c0_6, %c0_7] : memref<16x64xf32, #tpu.memory_space<vmem>>, vector<16x64xf32>
    tpu.vector_store %arg7[%c0_6, %c0_7], %8 {strides = array<i32>} : memref<16x64xf32, #tpu.memory_space<vmem>>, vector<16x64xf32>,
    %c0_i32_8 = arith.constant 0 : i32
    %10 = arith.cmpi eq, %arg2, %c0_i32_8 : i32
    %11 = arith.extui %10 : i1 to i32
    %c0_i32_9 = arith.constant 0 : i32
    %12 = arith.cmpi ne, %11, %c0_i32_9 : i32
    scf.if %12 {
      %c0_10 = arith.constant 0 : index
      %c0_11 = arith.constant 0 : index
      %13 = vector.load %arg7[%c0_10, %c0_11] : memref<16x64xf32, #tpu.memory_space<vmem>>, vector<16x64xf32>
      %c0_12 = arith.constant 0 : index
      %c0_13 = arith.constant 0 : index
      %14 = vector.load %arg5[%c0_12, %c0_13] : memref<1x64xf32, #tpu.memory_space<vmem>>, vector<1x64xf32>
      %15 = vector.broadcast %14 : vector<1x64xf32> to vector<16x64xf32>
      %16 = arith.addf %13, %15 : vector<16x64xf32>
      %17 = arith.truncf %16 : vector<16x64xf32> to vector<16x64xbf16>
      %c0_14 = arith.constant 0 : index
      %c0_15 = arith.constant 0 : index
      %18 = vector.load %arg6[%c0_14, %c0_15] : memref<16x64xbf16, #tpu.memory_space<vmem>>, vector<16x64xbf16>
      tpu.vector_store %arg6[%c0_14, %c0_15], %17 {strides = array<i32>} : memref<16x64xbf16, #tpu.memory_space<vmem>>, vector<16x64xbf16>,
    } else {
    }
    return
  }
  func.func @transform_0(%arg0: i32, %arg1: i32, %arg2: i32) -> (i32, i32) {
    %c0_i32 = arith.constant 0 : i32
    return %arg0, %arg2 : i32, i32
  }
  func.func @transform_1(%arg0: i32, %arg1: i32, %arg2: i32) -> (i32, i32) {
    %c0_i32 = arith.constant 0 : i32
    return %arg2, %arg1 : i32, i32
  }
  func.func @transform_2(%arg0: i32, %arg1: i32, %arg2: i32) -> (i32, i32) {
    %c0_i32 = arith.constant 0 : i32
    %c0_i32_0 = arith.constant 0 : i32
    return %c0_i32, %arg1 : i32, i32
  }
  func.func @transform_3(%arg0: i32, %arg1: i32, %arg2: i32) -> (i32, i32) {
    %c0_i32 = arith.constant 0 : i32
    return %arg0, %arg1 : i32, i32
  }
}

module attributes {stable_mosaic.version = 11 : i64} {
  func.func @_proj_add_ln_kernel(%arg0: i32, %arg1: memref<16x32xbf16, #tpu.memory_space<vmem>>, %arg2: memref<32x32xbf16, #tpu.memory_space<vmem>>, %arg3: memref<1x32xf32, #tpu.memory_space<vmem>>, %arg4: memref<16x32xf32, #tpu.memory_space<vmem>>, %arg5: memref<1x32xf32, #tpu.memory_space<vmem>>, %arg6: memref<1x32xf32, #tpu.memory_space<vmem>>, %arg7: memref<16x32xf32, #tpu.memory_space<vmem>>) attributes {dimension_semantics = [#tpu.dimension_semantics<parallel>], iteration_bounds = array<i64: 1>, scalar_prefetch = 0 : i64, scratch_operands = 0 : i64, tpu.core_type = #tpu.core_type<tc>, window_params = [{transform_indices = @transform_0, window_bounds = array<i64: 16, 32>}, {pipeline_mode = #tpu.pipeline_mode<synchronous>, transform_indices = @transform_1, window_bounds = array<i64: 32, 32>}, {pipeline_mode = #tpu.pipeline_mode<synchronous>, transform_indices = @transform_2, window_bounds = array<i64: 1, 32>}, {transform_indices = @transform_3, window_bounds = array<i64: 16, 32>}, {pipeline_mode = #tpu.pipeline_mode<synchronous>, transform_indices = @transform_4, window_bounds = array<i64: 1, 32>}, {pipeline_mode = #tpu.pipeline_mode<synchronous>, transform_indices = @transform_5, window_bounds = array<i64: 1, 32>}, {transform_indices = @transform_6, window_bounds = array<i64: 16, 32>}]} {
    %c0 = arith.constant 0 : index
    %c0_0 = arith.constant 0 : index
    %0 = vector.load %arg1[%c0, %c0_0] : memref<16x32xbf16, #tpu.memory_space<vmem>>, vector<16x32xbf16>
    %c0_1 = arith.constant 0 : index
    %c0_2 = arith.constant 0 : index
    %1 = vector.load %arg2[%c0_1, %c0_2] : memref<32x32xbf16, #tpu.memory_space<vmem>>, vector<32x32xbf16>
    %cst = arith.constant dense<0.000000e+00> : vector<16x32xf32>
    %2 = tpu.matmul %0, %1, %cst {dimension_numbers = #tpu.dot_dimension_numbers<[1], [0], [0], [1], [0, 0, 1, 1], [], []>} : vector<16x32xbf16>, vector<32x32xbf16>, vector<16x32xf32> -> vector<16x32xf32>
    %c0_3 = arith.constant 0 : index
    %c0_4 = arith.constant 0 : index
    %3 = vector.load %arg3[%c0_3, %c0_4] : memref<1x32xf32, #tpu.memory_space<vmem>>, vector<1x32xf32>
    %4 = vector.broadcast %3 : vector<1x32xf32> to vector<16x32xf32>
    %5 = arith.addf %2, %4 : vector<16x32xf32>
    %c0_5 = arith.constant 0 : index
    %c0_6 = arith.constant 0 : index
    %6 = vector.load %arg4[%c0_5, %c0_6] : memref<16x32xf32, #tpu.memory_space<vmem>>, vector<16x32xf32>
    %7 = arith.addf %5, %6 : vector<16x32xf32>
    %cst_7 = arith.constant dense<0.000000e+00> : vector<16xf32>
    %8 = vector.multi_reduction <add>, %7, %cst_7 [1] : vector<16x32xf32> to vector<16xf32>
    %9 = vector.shape_cast %8 : vector<16xf32> to vector<16x1xf32>
    %cst_8 = arith.constant 3.200000e+01 : f32
    %10 = vector.broadcast %cst_8 : f32 to vector<16x1xf32>
    %11 = arith.divf %9, %10 : vector<16x1xf32>
    %12 = vector.broadcast %11 : vector<16x1xf32> to vector<16x32xf32>
    %13 = arith.subf %7, %12 : vector<16x32xf32>
    %14 = arith.mulf %13, %13 : vector<16x32xf32>
    %cst_9 = arith.constant dense<0.000000e+00> : vector<16xf32>
    %15 = vector.multi_reduction <add>, %14, %cst_9 [1] : vector<16x32xf32> to vector<16xf32>
    %16 = vector.shape_cast %15 : vector<16xf32> to vector<16x1xf32>
    %cst_10 = arith.constant 3.200000e+01 : f32
    %17 = vector.broadcast %cst_10 : f32 to vector<16x1xf32>
    %18 = arith.divf %16, %17 : vector<16x1xf32>
    %19 = vector.broadcast %11 : vector<16x1xf32> to vector<16x32xf32>
    %20 = arith.subf %7, %19 : vector<16x32xf32>
    %cst_11 = arith.constant 9.99999974E-6 : f32
    %21 = vector.broadcast %cst_11 : f32 to vector<16x1xf32>
    %22 = arith.addf %18, %21 : vector<16x1xf32>
    %23 = math.rsqrt %22 : vector<16x1xf32>
    %24 = vector.broadcast %23 : vector<16x1xf32> to vector<16x32xf32>
    %25 = arith.mulf %20, %24 : vector<16x32xf32>
    %c0_12 = arith.constant 0 : index
    %c0_13 = arith.constant 0 : index
    %26 = vector.load %arg5[%c0_12, %c0_13] : memref<1x32xf32, #tpu.memory_space<vmem>>, vector<1x32xf32>
    %27 = vector.broadcast %26 : vector<1x32xf32> to vector<16x32xf32>
    %28 = arith.mulf %25, %27 : vector<16x32xf32>
    %c0_14 = arith.constant 0 : index
    %c0_15 = arith.constant 0 : index
    %29 = vector.load %arg6[%c0_14, %c0_15] : memref<1x32xf32, #tpu.memory_space<vmem>>, vector<1x32xf32>
    %30 = vector.broadcast %29 : vector<1x32xf32> to vector<16x32xf32>
    %31 = arith.addf %28, %30 : vector<16x32xf32>
    %c0_16 = arith.constant 0 : index
    %c0_17 = arith.constant 0 : index
    %32 = vector.load %arg7[%c0_16, %c0_17] : memref<16x32xf32, #tpu.memory_space<vmem>>, vector<16x32xf32>
    tpu.vector_store %arg7[%c0_16, %c0_17], %31 {strides = array<i32>} : memref<16x32xf32, #tpu.memory_space<vmem>>, vector<16x32xf32>,
    return
  }
  func.func @transform_0(%arg0: i32) -> (i32, i32) {
    %c0_i32 = arith.constant 0 : i32
    %c0_i32_0 = arith.constant 0 : i32
    return %arg0, %c0_i32 : i32, i32
  }
  func.func @transform_1(%arg0: i32) -> (i32, i32) {
    %c0_i32 = arith.constant 0 : i32
    %c0_i32_0 = arith.constant 0 : i32
    %c0_i32_1 = arith.constant 0 : i32
    return %c0_i32, %c0_i32_0 : i32, i32
  }
  func.func @transform_2(%arg0: i32) -> (i32, i32) {
    %c0_i32 = arith.constant 0 : i32
    %c0_i32_0 = arith.constant 0 : i32
    %c0_i32_1 = arith.constant 0 : i32
    return %c0_i32, %c0_i32_0 : i32, i32
  }
  func.func @transform_3(%arg0: i32) -> (i32, i32) {
    %c0_i32 = arith.constant 0 : i32
    %c0_i32_0 = arith.constant 0 : i32
    return %arg0, %c0_i32 : i32, i32
  }
  func.func @transform_4(%arg0: i32) -> (i32, i32) {
    %c0_i32 = arith.constant 0 : i32
    %c0_i32_0 = arith.constant 0 : i32
    %c0_i32_1 = arith.constant 0 : i32
    return %c0_i32, %c0_i32_0 : i32, i32
  }
  func.func @transform_5(%arg0: i32) -> (i32, i32) {
    %c0_i32 = arith.constant 0 : i32
    %c0_i32_0 = arith.constant 0 : i32
    %c0_i32_1 = arith.constant 0 : i32
    return %c0_i32, %c0_i32_0 : i32, i32
  }
  func.func @transform_6(%arg0: i32) -> (i32, i32) {
    %c0_i32 = arith.constant 0 : i32
    %c0_i32_0 = arith.constant 0 : i32
    return %arg0, %c0_i32 : i32, i32
  }
}

module attributes {stable_mosaic.version = 11 : i64} {
  func.func @_cross_attn_kernel(%arg0: i32, %arg1: i32, %arg2: i32, %arg3: memref<1x1x8x8xbf16, #tpu.memory_space<vmem>>, %arg4: memref<1x1x1x8x8xbf16, #tpu.memory_space<vmem>>, %arg5: memref<1x1x1x8x8xbf16, #tpu.memory_space<vmem>>, %arg6: memref<1x1x8xf32, #tpu.memory_space<vmem>>, %arg7: memref<1x1x8x8xbf16, #tpu.memory_space<vmem>>, %arg8: memref<1x1x8x8xf32, #tpu.memory_space<vmem>>) attributes {dimension_semantics = [#tpu.dimension_semantics<parallel>, #tpu.dimension_semantics<parallel>, #tpu.dimension_semantics<parallel>], iteration_bounds = array<i64: 2, 4, 1>, scalar_prefetch = 0 : i64, scratch_operands = 0 : i64, tpu.core_type = #tpu.core_type<tc>, window_params = [{transform_indices = @transform_0, window_bounds = array<i64: 1, 1, 8, 8>}, {transform_indices = @transform_1, window_bounds = array<i64: 1, 1, 1, 8, 8>}, {transform_indices = @transform_2, window_bounds = array<i64: 1, 1, 1, 8, 8>}, {transform_indices = @transform_3, window_bounds = array<i64: 1, 1, 8>}, {transform_indices = @transform_4, window_bounds = array<i64: 1, 1, 8, 8>}, {transform_indices = @transform_5, window_bounds = array<i64: 1, 1, 8, 8>}]} {
    %c0 = arith.constant 0 : index
    %c0_0 = arith.constant 0 : index
    %c0_1 = arith.constant 0 : index
    %c0_2 = arith.constant 0 : index
    %0 = vector.load %arg3[%c0, %c0_0, %c0_1, %c0_2] : memref<1x1x8x8xbf16, #tpu.memory_space<vmem>>, vector<1x1x8x8xbf16>
    %1 = vector.shape_cast %0 : vector<1x1x8x8xbf16> to vector<8x8xbf16>
    %cst = arith.constant 3.535160e-01 : bf16
    %2 = vector.broadcast %cst : bf16 to vector<8x8xbf16>
    %3 = arith.mulf %1, %2 : vector<8x8xbf16>
    %c0_3 = arith.constant 0 : index
    %c0_4 = arith.constant 0 : index
    %c0_5 = arith.constant 0 : index
    %c0_6 = arith.constant 0 : index
    %c0_7 = arith.constant 0 : index
    %4 = vector.load %arg4[%c0_3, %c0_4, %c0_5, %c0_6, %c0_7] : memref<1x1x1x8x8xbf16, #tpu.memory_space<vmem>>, vector<1x1x1x8x8xbf16>
    %5 = vector.shape_cast %4 : vector<1x1x1x8x8xbf16> to vector<8x8xbf16>
    %c0_8 = arith.constant 0 : index
    %c0_9 = arith.constant 0 : index
    %c0_10 = arith.constant 0 : index
    %c0_11 = arith.constant 0 : index
    %c0_12 = arith.constant 0 : index
    %6 = vector.load %arg5[%c0_8, %c0_9, %c0_10, %c0_11, %c0_12] : memref<1x1x1x8x8xbf16, #tpu.memory_space<vmem>>, vector<1x1x1x8x8xbf16>
    %7 = vector.shape_cast %6 : vector<1x1x1x8x8xbf16> to vector<8x8xbf16>
    %c0_13 = arith.constant 0 : index
    %c0_14 = arith.constant 0 : index
    %c0_15 = arith.constant 0 : index
    %8 = vector.load %arg6[%c0_13, %c0_14, %c0_15] : memref<1x1x8xf32, #tpu.memory_space<vmem>>, vector<1x1x8xf32>
    %9 = vector.shape_cast %8 : vector<1x1x8xf32> to vector<1x8xf32>
    %cst_16 = arith.constant 0.000000e+00 : f32
    %10 = vector.broadcast %cst_16 : f32 to vector<1x8xf32>
    %11 = arith.cmpf ogt, %9, %10 : vector<1x8xf32>
    %12 = tpu.transpose %5, [1, 0] : vector<8x8xbf16> -> vector<8x8xbf16>
    %cst_17 = arith.constant dense<0.000000e+00> : vector<8x8xf32>
    %13 = tpu.matmul %3, %12, %cst_17 {dimension_numbers = #tpu.dot_dimension_numbers<[1], [0], [0], [1], [0, 0, 1, 1], [], []>} : vector<8x8xbf16>, vector<8x8xbf16>, vector<8x8xf32> -> vector<8x8xf32>
    %cst_18 = arith.constant -1.000000e+09 : f32
    %14 = vector.shape_cast %11 : vector<1x8xi1> to vector<1x8xi1>
    %15 = vector.broadcast %14 : vector<1x8xi1> to vector<8x8xi1>
    %16 = vector.broadcast %cst_18 : f32 to vector<8x8xf32>
    %17 = arith.select %15, %13, %16 : vector<8x8xi1>, vector<8x8xf32>
    %cst_19 = arith.constant dense<0xFF800000> : vector<8xf32>
    %18 = vector.multi_reduction <maximumf>, %17, %cst_19 [1] : vector<8x8xf32> to vector<8xf32>
    %19 = vector.shape_cast %18 : vector<8xf32> to vector<8x1xf32>
    %20 = vector.broadcast %19 : vector<8x1xf32> to vector<8x8xf32>
    %21 = arith.subf %17, %20 : vector<8x8xf32>
    %22 = math.exp %21 : vector<8x8xf32>
    %cst_20 = arith.constant dense<0.000000e+00> : vector<8xf32>
    %23 = vector.multi_reduction <add>, %22, %cst_20 [1] : vector<8x8xf32> to vector<8xf32>
    %24 = vector.shape_cast %23 : vector<8xf32> to vector<8x1xf32>
    %25 = vector.broadcast %24 : vector<8x1xf32> to vector<8x8xf32>
    %26 = arith.divf %22, %25 : vector<8x8xf32>
    %c0_21 = arith.constant 0 : index
    %c0_22 = arith.constant 0 : index
    %c0_23 = arith.constant 0 : index
    %c0_24 = arith.constant 0 : index
    %27 = vector.load %arg8[%c0_21, %c0_22, %c0_23, %c0_24] : memref<1x1x8x8xf32, #tpu.memory_space<vmem>>, vector<1x1x8x8xf32>
    %28 = vector.shape_cast %27 : vector<1x1x8x8xf32> to vector<8x8xf32>
    %29 = vector.shape_cast %26 : vector<8x8xf32> to vector<1x1x8x8xf32>
    tpu.vector_store %arg8[%c0_21, %c0_22, %c0_23, %c0_24], %29 {strides = array<i32>} : memref<1x1x8x8xf32, #tpu.memory_space<vmem>>, vector<1x1x8x8xf32>,
    %30 = arith.truncf %26 : vector<8x8xf32> to vector<8x8xbf16>
    %cst_25 = arith.constant dense<0.000000e+00> : vector<8x8xf32>
    %31 = tpu.matmul %30, %7, %cst_25 {dimension_numbers = #tpu.dot_dimension_numbers<[1], [0], [0], [1], [0, 0, 1, 1], [], []>} : vector<8x8xbf16>, vector<8x8xbf16>, vector<8x8xf32> -> vector<8x8xf32>
    %32 = arith.truncf %31 : vector<8x8xf32> to vector<8x8xbf16>
    %c0_26 = arith.constant 0 : index
    %c0_27 = arith.constant 0 : index
    %c0_28 = arith.constant 0 : index
    %c0_29 = arith.constant 0 : index
    %33 = vector.load %arg7[%c0_26, %c0_27, %c0_28, %c0_29] : memref<1x1x8x8xbf16, #tpu.memory_space<vmem>>, vector<1x1x8x8xbf16>
    %34 = vector.shape_cast %33 : vector<1x1x8x8xbf16> to vector<8x8xbf16>
    %35 = vector.shape_cast %32 : vector<8x8xbf16> to vector<1x1x8x8xbf16>
    tpu.vector_store %arg7[%c0_26, %c0_27, %c0_28, %c0_29], %35 {strides = array<i32>} : memref<1x1x8x8xbf16, #tpu.memory_space<vmem>>, vector<1x1x8x8xbf16>,
    return
  }
  func.func @transform_0(%arg0: i32, %arg1: i32, %arg2: i32) -> (i32, i32, i32, i32) {
    %c0_i32 = arith.constant 0 : i32
    %c0_i32_0 = arith.constant 0 : i32
    return %arg0, %arg1, %arg2, %c0_i32 : i32, i32, i32, i32
  }
  func.func @transform_1(%arg0: i32, %arg1: i32, %arg2: i32) -> (i32, i32, i32, i32, i32) {
    %c0_i32 = arith.constant 0 : i32
    %c0_i32_0 = arith.constant 0 : i32
    %c0_i32_1 = arith.constant 0 : i32
    %c0_i32_2 = arith.constant 0 : i32
    return %c0_i32, %arg0, %arg1, %c0_i32_0, %c0_i32_1 : i32, i32, i32, i32, i32
  }
  func.func @transform_2(%arg0: i32, %arg1: i32, %arg2: i32) -> (i32, i32, i32, i32, i32) {
    %c1_i32 = arith.constant 1 : i32
    %c0_i32 = arith.constant 0 : i32
    %c0_i32_0 = arith.constant 0 : i32
    %c0_i32_1 = arith.constant 0 : i32
    return %c1_i32, %arg0, %arg1, %c0_i32, %c0_i32_0 : i32, i32, i32, i32, i32
  }
  func.func @transform_3(%arg0: i32, %arg1: i32, %arg2: i32) -> (i32, i32, i32) {
    %c0_i32 = arith.constant 0 : i32
    %c0_i32_0 = arith.constant 0 : i32
    %c0_i32_1 = arith.constant 0 : i32
    return %arg0, %c0_i32, %c0_i32_0 : i32, i32, i32
  }
  func.func @transform_4(%arg0: i32, %arg1: i32, %arg2: i32) -> (i32, i32, i32, i32) {
    %c0_i32 = arith.constant 0 : i32
    %c0_i32_0 = arith.constant 0 : i32
    return %arg0, %arg1, %arg2, %c0_i32 : i32, i32, i32, i32
  }
  func.func @transform_5(%arg0: i32, %arg1: i32, %arg2: i32) -> (i32, i32, i32, i32) {
    %c0_i32 = arith.constant 0 : i32
    %c0_i32_0 = arith.constant 0 : i32
    return %arg0, %arg1, %arg2, %c0_i32 : i32, i32, i32, i32
  }
}

module attributes {stable_mosaic.version = 11 : i64} {
  func.func @_ffn_add_ln_kernel(%arg0: i32, %arg1: i32, %arg2: memref<16x32xf32, #tpu.memory_space<vmem>>, %arg3: memref<32x64xbf16, #tpu.memory_space<vmem>>, %arg4: memref<1x64xf32, #tpu.memory_space<vmem>>, %arg5: memref<64x32xbf16, #tpu.memory_space<vmem>>, %arg6: memref<1x32xf32, #tpu.memory_space<vmem>>, %arg7: memref<1x32xf32, #tpu.memory_space<vmem>>, %arg8: memref<1x32xf32, #tpu.memory_space<vmem>>, %arg9: memref<16x32xf32, #tpu.memory_space<vmem>>, %arg10: memref<16x32xf32, #tpu.memory_space<vmem>>) attributes {dimension_semantics = [#tpu.dimension_semantics<parallel>, #tpu.dimension_semantics<arbitrary>], iteration_bounds = array<i64: 1, 1>, scalar_prefetch = 0 : i64, scratch_operands = 1 : i64, tpu.core_type = #tpu.core_type<tc>, window_params = [{transform_indices = @transform_0, window_bounds = array<i64: 16, 32>}, {transform_indices = @transform_1, window_bounds = array<i64: 32, 64>}, {transform_indices = @transform_2, window_bounds = array<i64: 1, 64>}, {transform_indices = @transform_3, window_bounds = array<i64: 64, 32>}, {pipeline_mode = #tpu.pipeline_mode<synchronous>, transform_indices = @transform_4, window_bounds = array<i64: 1, 32>}, {pipeline_mode = #tpu.pipeline_mode<synchronous>, transform_indices = @transform_5, window_bounds = array<i64: 1, 32>}, {pipeline_mode = #tpu.pipeline_mode<synchronous>, transform_indices = @transform_6, window_bounds = array<i64: 1, 32>}, {transform_indices = @transform_7, window_bounds = array<i64: 16, 32>}]} {
    %c0_i32 = arith.constant 0 : i32
    %0 = arith.cmpi eq, %arg1, %c0_i32 : i32
    %1 = arith.extui %0 : i1 to i32
    %c0_i32_0 = arith.constant 0 : i32
    %2 = arith.cmpi ne, %1, %c0_i32_0 : i32
    scf.if %2 {
      %cst_16 = arith.constant 0.000000e+00 : f32
      %21 = vector.broadcast %cst_16 : f32 to vector<16x32xf32>
      %c0_17 = arith.constant 0 : index
      %c0_18 = arith.constant 0 : index
      %22 = vector.load %arg10[%c0_17, %c0_18] : memref<16x32xf32, #tpu.memory_space<vmem>>, vector<16x32xf32>
      tpu.vector_store %arg10[%c0_17, %c0_18], %21 {strides = array<i32>} : memref<16x32xf32, #tpu.memory_space<vmem>>, vector<16x32xf32>,
    } else {
    }
    %c0 = arith.constant 0 : index
    %c0_1 = arith.constant 0 : index
    %3 = vector.load %arg2[%c0, %c0_1] : memref<16x32xf32, #tpu.memory_space<vmem>>, vector<16x32xf32>
    %4 = arith.truncf %3 : vector<16x32xf32> to vector<16x32xbf16>
    %c0_2 = arith.constant 0 : index
    %c0_3 = arith.constant 0 : index
    %5 = vector.load %arg3[%c0_2, %c0_3] : memref<32x64xbf16, #tpu.memory_space<vmem>>, vector<32x64xbf16>
    %cst = arith.constant dense<0.000000e+00> : vector<16x64xf32>
    %6 = tpu.matmul %4, %5, %cst {dimension_numbers = #tpu.dot_dimension_numbers<[1], [0], [0], [1], [0, 0, 1, 1], [], []>} : vector<16x32xbf16>, vector<32x64xbf16>, vector<16x64xf32> -> vector<16x64xf32>
    %c0_4 = arith.constant 0 : index
    %c0_5 = arith.constant 0 : index
    %7 = vector.load %arg4[%c0_4, %c0_5] : memref<1x64xf32, #tpu.memory_space<vmem>>, vector<1x64xf32>
    %8 = vector.broadcast %7 : vector<1x64xf32> to vector<16x64xf32>
    %9 = arith.addf %6, %8 : vector<16x64xf32>
    %cst_6 = arith.constant 0.000000e+00 : f32
    %10 = vector.broadcast %cst_6 : f32 to vector<16x64xf32>
    %11 = arith.maximumf %9, %10 : vector<16x64xf32>
    %c0_7 = arith.constant 0 : index
    %c0_8 = arith.constant 0 : index
    %12 = vector.load %arg10[%c0_7, %c0_8] : memref<16x32xf32, #tpu.memory_space<vmem>>, vector<16x32xf32>
    %13 = arith.truncf %11 : vector<16x64xf32> to vector<16x64xbf16>
    %c0_9 = arith.constant 0 : index
    %c0_10 = arith.constant 0 : index
    %14 = vector.load %arg5[%c0_9, %c0_10] : memref<64x32xbf16, #tpu.memory_space<vmem>>, vector<64x32xbf16>
    %cst_11 = arith.constant dense<0.000000e+00> : vector<16x32xf32>
    %15 = tpu.matmul %13, %14, %cst_11 {dimension_numbers = #tpu.dot_dimension_numbers<[1], [0], [0], [1], [0, 0, 1, 1], [], []>} : vector<16x64xbf16>, vector<64x32xbf16>, vector<16x32xf32> -> vector<16x32xf32>
    %16 = arith.addf %12, %15 : vector<16x32xf32>
    %c0_12 = arith.constant 0 : index
    %c0_13 = arith.constant 0 : index
    %17 = vector.load %arg10[%c0_12, %c0_13] : memref<16x32xf32, #tpu.memory_space<vmem>>, vector<16x32xf32>
    tpu.vector_store %arg10[%c0_12, %c0_13], %16 {strides = array<i32>} : memref<16x32xf32, #tpu.memory_space<vmem>>, vector<16x32xf32>,
    %c0_i32_14 = arith.constant 0 : i32
    %18 = arith.cmpi eq, %arg1, %c0_i32_14 : i32
    %19 = arith.extui %18 : i1 to i32
    %c0_i32_15 = arith.constant 0 : i32
    %20 = arith.cmpi ne, %19, %c0_i32_15 : i32
    scf.if %20 {
      %c0_16 = arith.constant 0 : index
      %c0_17 = arith.constant 0 : index
      %21 = vector.load %arg10[%c0_16, %c0_17] : memref<16x32xf32, #tpu.memory_space<vmem>>, vector<16x32xf32>
      %c0_18 = arith.constant 0 : index
      %c0_19 = arith.constant 0 : index
      %22 = vector.load %arg6[%c0_18, %c0_19] : memref<1x32xf32, #tpu.memory_space<vmem>>, vector<1x32xf32>
      %23 = vector.broadcast %22 : vector<1x32xf32> to vector<16x32xf32>
      %24 = arith.addf %21, %23 : vector<16x32xf32>
      %c0_20 = arith.constant 0 : index
      %c0_21 = arith.constant 0 : index
      %25 = vector.load %arg2[%c0_20, %c0_21] : memref<16x32xf32, #tpu.memory_space<vmem>>, vector<16x32xf32>
      %26 = arith.addf %24, %25 : vector<16x32xf32>
      %cst_22 = arith.constant dense<0.000000e+00> : vector<16xf32>
      %27 = vector.multi_reduction <add>, %26, %cst_22 [1] : vector<16x32xf32> to vector<16xf32>
      %28 = vector.shape_cast %27 : vector<16xf32> to vector<16x1xf32>
      %cst_23 = arith.constant 3.200000e+01 : f32
      %29 = vector.broadcast %cst_23 : f32 to vector<16x1xf32>
      %30 = arith.divf %28, %29 : vector<16x1xf32>
      %31 = vector.broadcast %30 : vector<16x1xf32> to vector<16x32xf32>
      %32 = arith.subf %26, %31 : vector<16x32xf32>
      %33 = arith.mulf %32, %32 : vector<16x32xf32>
      %cst_24 = arith.constant dense<0.000000e+00> : vector<16xf32>
      %34 = vector.multi_reduction <add>, %33, %cst_24 [1] : vector<16x32xf32> to vector<16xf32>
      %35 = vector.shape_cast %34 : vector<16xf32> to vector<16x1xf32>
      %cst_25 = arith.constant 3.200000e+01 : f32
      %36 = vector.broadcast %cst_25 : f32 to vector<16x1xf32>
      %37 = arith.divf %35, %36 : vector<16x1xf32>
      %38 = vector.broadcast %30 : vector<16x1xf32> to vector<16x32xf32>
      %39 = arith.subf %26, %38 : vector<16x32xf32>
      %cst_26 = arith.constant 9.99999974E-6 : f32
      %40 = vector.broadcast %cst_26 : f32 to vector<16x1xf32>
      %41 = arith.addf %37, %40 : vector<16x1xf32>
      %42 = math.rsqrt %41 : vector<16x1xf32>
      %43 = vector.broadcast %42 : vector<16x1xf32> to vector<16x32xf32>
      %44 = arith.mulf %39, %43 : vector<16x32xf32>
      %c0_27 = arith.constant 0 : index
      %c0_28 = arith.constant 0 : index
      %45 = vector.load %arg7[%c0_27, %c0_28] : memref<1x32xf32, #tpu.memory_space<vmem>>, vector<1x32xf32>
      %46 = vector.broadcast %45 : vector<1x32xf32> to vector<16x32xf32>
      %47 = arith.mulf %44, %46 : vector<16x32xf32>
      %c0_29 = arith.constant 0 : index
      %c0_30 = arith.constant 0 : index
      %48 = vector.load %arg8[%c0_29, %c0_30] : memref<1x32xf32, #tpu.memory_space<vmem>>, vector<1x32xf32>
      %49 = vector.broadcast %48 : vector<1x32xf32> to vector<16x32xf32>
      %50 = arith.addf %47, %49 : vector<16x32xf32>
      %c0_31 = arith.constant 0 : index
      %c0_32 = arith.constant 0 : index
      %51 = vector.load %arg9[%c0_31, %c0_32] : memref<16x32xf32, #tpu.memory_space<vmem>>, vector<16x32xf32>
      tpu.vector_store %arg9[%c0_31, %c0_32], %50 {strides = array<i32>} : memref<16x32xf32, #tpu.memory_space<vmem>>, vector<16x32xf32>,
    } else {
    }
    return
  }
  func.func @transform_0(%arg0: i32, %arg1: i32) -> (i32, i32) {
    %c0_i32 = arith.constant 0 : i32
    %c0_i32_0 = arith.constant 0 : i32
    return %arg0, %c0_i32 : i32, i32
  }
  func.func @transform_1(%arg0: i32, %arg1: i32) -> (i32, i32) {
    %c0_i32 = arith.constant 0 : i32
    %c0_i32_0 = arith.constant 0 : i32
    return %c0_i32, %arg1 : i32, i32
  }
  func.func @transform_2(%arg0: i32, %arg1: i32) -> (i32, i32) {
    %c0_i32 = arith.constant 0 : i32
    %c0_i32_0 = arith.constant 0 : i32
    return %c0_i32, %arg1 : i32, i32
  }
  func.func @transform_3(%arg0: i32, %arg1: i32) -> (i32, i32) {
    %c0_i32 = arith.constant 0 : i32
    %c0_i32_0 = arith.constant 0 : i32
    return %arg1, %c0_i32 : i32, i32
  }
  func.func @transform_4(%arg0: i32, %arg1: i32) -> (i32, i32) {
    %c0_i32 = arith.constant 0 : i32
    %c0_i32_0 = arith.constant 0 : i32
    %c0_i32_1 = arith.constant 0 : i32
    return %c0_i32, %c0_i32_0 : i32, i32
  }
  func.func @transform_5(%arg0: i32, %arg1: i32) -> (i32, i32) {
    %c0_i32 = arith.constant 0 : i32
    %c0_i32_0 = arith.constant 0 : i32
    %c0_i32_1 = arith.constant 0 : i32
    return %c0_i32, %c0_i32_0 : i32, i32
  }
  func.func @transform_6(%arg0: i32, %arg1: i32) -> (i32, i32) {
    %c0_i32 = arith.constant 0 : i32
    %c0_i32_0 = arith.constant 0 : i32
    %c0_i32_1 = arith.constant 0 : i32
    return %c0_i32, %c0_i32_0 : i32, i32
  }
  func.func @transform_7(%arg0: i32, %arg1: i32) -> (i32, i32) {
    %c0_i32 = arith.constant 0 : i32
    %c0_i32_0 = arith.constant 0 : i32
    return %arg0, %c0_i32 : i32, i32
  }
}

</mosaic_0001>

<bundles_post_ra>
// kernel: decoder_block_forward.7
= control target key start
LH: loop header
LB: loop body
LE: loop exit
PB: predicated region body
PF: predicated region fallthrough
CT: control target
= control target key end

     0   :  { %vm19_vm0 = vcmask 785408   ;;  %v145_v0 = vmov 0.0   ;;  %vm146_vm1 = vmmov 0   ;;  %vm43_vm2 = vcmask 261120   ;;  %s192_s1 = inlined_call_operand.vmem [shape: bf16[32,96], index: 1, kind: input, shape index: {}]   ;;  %s193_s0 = inlined_call_operand.vmem [shape: f32[16,32], index: 0, kind: input, shape index: {}]   ;;  %s194_s2 = inlined_call_operand.vmem [shape: f32[1,96], index: 2, kind: input, shape index: {}]   ;;  %s195_s3 = inlined_call_operand.vmem [shape: bf16[16,96], index: 3, kind: output, shape index: {}]  }
   0x1   :  { %133 = vmatprep.subr.bf16.mxu0 %v145_v0  ;;  %v143_v1 = vld [vmem:[%s192_s1 + $0x8] sm:$0xff]   ;;  %137 = vmatprep.mubr.msk.bf16.mxu0 %vm146_vm1, %v145_v0  ;;  %20 = vst.msk [vmem:[#allocation2] sm:$0xff] %vm19_vm0, %v145_v0  ;;  %21 = vst.msk [vmem:[#allocation2 + $0x8] sm:$0xff] %vm19_vm0, %v145_v0  ;;  %v144_v2 = vld [vmem:[%s192_s1] sm:$0xff]   ;;  %vm115_vm3 = vcmask 781312  }
   0x2   :  { %134 = vmatpush3.bf16.msra.mxu0 %v143_v1  ;;  %v24_v3 = vld [vmem:[%s193_s0] sm:$0xff]  ;;  %v25_v4 = vld [vmem:[%s193_s0 + $0x8] sm:$0xff] }
   0x3   :  { %135 = vmatprep.subr.bf16.mxu0 %v145_v0  ;;  %v26_v5 = vpack.c.bf16 %v25_v4, %v24_v3  ;;  %v125_v14 = vld [vmem:[%s194_s2] ss:$0 sm:$0xff] }
   0x6   :  { %136 = vmatpush3.bf16.msra.mxu0 %v144_v2 }
   0x8   :  { %v22_v6 = vld [vmem:[#allocation2] sm:$0xff]  ;;  %v23_v10 = vld [vmem:[#allocation2 + $0x8] sm:$0xff] }
   0x9   :  { %138 = vmatmul.mubr.msk.bf16.vlgmr.msra.gmra.mxu0 %vm43_vm2, %v26_v5 }
  0xc9   :  { %v81_v7 = vpop.f32.mrf.mxu0 }
  0xca   :  { %v88_v8 = vadd.f32 %v81_v7, %v22_v6 }
  0xcb   :  { %v139_v9 = vpop.f32.mrf.mxu0 }
  0xcc   :  { %91 = vst.msk [vmem:[#allocation2] sm:$0xff] %vm19_vm0, %v88_v8 }
  0xcd   :  { %v84_v11 = vpop.f32.mrf.mxu0 }
  0xce   :  { %v89_v12 = vadd.f32 %v84_v11, %v23_v10 }
  0xcf   :  { %v140_v13 = vpop.f32.mrf.mxu0 }
  0xd0   :  { %92 = vst.msk [vmem:[#allocation2 + $0x8] sm:$0xff] %vm19_vm0, %v89_v12 }
  0xd3   :  { %v96_v15 = vld [vmem:[#allocation2] sm:$0xff] }
  0xd4   :  { %v105_v16 = vadd.f32 %v125_v14, %v96_v15 }
  0xd6   :  { %v128_v17 = vpack.c.bf16 %v105_v16, %v105_v16 }
  0xd7   :  { %v97_v18 = vld [vmem:[#allocation2 + $0x8] sm:$0xff] }
  0xd8   :  { %116 = vst.msk [vmem:[%s195_s3] sm:$0xf] %vm115_vm3, %v128_v17  ;;  %v106_v19 = vadd.f32 %v125_v14, %v97_v18 }
  0xda   :  { %v129_v20 = vpack.c.bf16 %v106_v19, %v106_v19 }
  0xdc   :  { %117 = vst.msk [vmem:[%s195_s3 + $0x4] sm:$0xf] %vm115_vm3, %v129_v20 }

// kernel: decoder_block_forward.8
= control target key start
LH: loop header
LB: loop body
LE: loop exit
PB: predicated region body
PF: predicated region fallthrough
CT: control target
= control target key end

     0   :  { %s764_s15 = smov 0   ;;  %s766_s16 = smov 0   ;;  %s835_s0 = inlined_call_operand.vmem [shape: bf16[3,2,4,8,8], index: 0, kind: input, shape index: {}, may-alias: {0,1,2}]   ;;  %s836_s1 = inlined_call_operand.vmem [shape: bf16[3,2,4,8,8], index: 1, kind: input, shape index: {}, may-alias: {0,1,2}]   ;;  %s837_s2 = inlined_call_operand.vmem [shape: bf16[3,2,4,8,8], index: 2, kind: input, shape index: {}, may-alias: {0,1,2}]   ;;  %s838_s3 = inlined_call_operand.vmem [shape: f32[2,1,8], index: 3, kind: input, shape index: {}]   ;;  %s839_s4 = inlined_call_operand.vmem [shape: bf16[2,4,8,8], index: 4, kind: output, shape index: {}]  }
   0x1   :  { %s768_s17 = smov 0   ;;  %s770_s18 = smov 0  }
   0x2   :  { %s772_s19 = smov 0  }
   0x3 LB: > { %s29_s20 = sadd.s32 1, %s726_s17  ;;  %s33_s21 = sadd.s32 1, %s730_s18  ;;  %s734_s19 = sphi %s772_s19, %s14_s19   ;;  %s730_s18 = sphi %s770_s18, %s843_s18   ;;  %s726_s17 = sphi %s768_s17, %s842_s17   ;;  %s722_s16 = sphi %s766_s16, %s841_s16   ;;  %s718_s15 = sphi %s764_s15, %s840_s15  }
   0x4   : > { %p31_p0 = scmp.ge.s32.totalorder %s29_s20, 4  ;;  %p618_p1 = scmp.ge.s32.totalorder %s734_s19, 1 }
   0x5   : > { %p235_p2 = scmp.lt.s32.totalorder %s734_s19, 9 }
   0x6   : > { %s845_s20 = smov (%p31_p0, %s29_s20), 0  ;;  %s847_s21 = smov (!%p31_p0, %s33_s21), %s730_s18 }
   0x7   : > { %p236_p3 = pnand %p618_p1, %p235_p2  ;;  %p35_p4 = scmp.ge.s32.totalorder %s847_s21, 2 }
   0x8   : > { %p294_p5 = scmp.lt.s32.totalorder (!%p236_p3), %s722_s16, 1  ;;  %p296_p6 = scmp.lt.s32.totalorder (!%p236_p3), %s718_s15, 3 }
   0x9   : > { %s849_s21 = smov (%p35_p4, %s847_s21), 0  ;;  %239 = sbr.rel (%p236_p3) target bundleno = 735 (0x2df), region = 36 }
   0xe   : > { %v736_v0 = vmov 0.0   ;;  %vm737_vm0 = vmmov 0   ;;  %s851_s16 = smov (!%p294_p5, %s722_s16), 1  ;;  %s853_s15 = smov (!%p296_p6, %s718_s15), 3  ;;  %vm345_vm1 = vcmask 64512   ;;  %v393_v5 = vlaneseq }
   0xf   : > { %637 = vmatprep.subr.bf16.mxu0 %v736_v0  ;;  %639 = vmatprep.mubr.msk.bf16.mxu0 %vm737_vm0, %v736_v0  ;;  %s619_s22 = sshll.u32 %s851_s16, 2  ;;  %s325_s7 = scalar_lea.vmem %s838_s3, %s851_s16  ;;  %v738_v9 = vmov 0   ;;  %vm414_vm4 = vcmask 1043456   ;;  %vm459_vm5 = vcmask 60416  }
  0x10   : > { %643 = vmatprep.subr.bf16.mxu1 %v736_v0  ;;  %645 = vmatprep.mubr.msk.bf16.mxu1 %vm737_vm0, %v736_v0  ;;  %s302_s23 = sadd.s32 %s619_s22, %s853_s15  ;;  %v343_v6 = vld [vmem:[%s325_s7] sm:$0x1]  ;;  %v394_v7 = vshrl.u32 %v393_v5, 7 }
  0x11   : > { %s794_s24 = sshll.u32 %s302_s23, 2  ;;  %vm344_vm2 = vcmp.gt.f32.partialorder %v343_v6, 0.0 }
  0x12   : > { %s539_s27 = scalar_lea.vmem %s836_s1, %s794_s24  ;;  %s304_s30 = scalar_lea.vmem %s835_s0, %s794_s24  ;;  %v395_v8 = vsub.s32 0, %v394_v7  ;;  %v392_v10 = vsel %vm344_vm2, 1, %v738_v9 }
  0x13   : > { %v627_v1 = vld [vmem:[%s539_s27 + $0x20] sm:$0xf]  ;;  %s544_s10 = scalar_lea.vmem %s837_s2, %s794_s24  ;;  %s336_s13 = scalar_lea.vmem %s839_s4, %s794_s24 }
  0x14   : > { %v350_v2 = vsel %vm345_vm1, %v627_v1, 0  ;;  %v339_v3 = vld [vmem:[%s304_s30] sm:$0xf]  ;;  %v396_v11 = vrot.slane %v392_v10, %v395_v8 }
  0x15   : > { %638 = vmatpush3.bf16.xpose.msra.mxu0 %v350_v2  ;;  %v340_v4 = vmul.bf16 1052065461, %v339_v3  ;;  %v628_v23 = vld [vmem:[%s544_s10 + $0x40] sm:$0xf] }
  0x16   : > { %vm397_vm3 = vcmp.eq.s32.totalorder %v396_v11, 1  ;;  %v416_v24 = vsel %vm414_vm4, %v628_v23, 0 }
  0x17   : > { %644 = vmatpush3.bf16.msra.mxu1 %v416_v24 }
  0x1c   : > { %640 = vmatmul.mubr.msk.bf16.vlgmr.msra.gmra.mxu0 %vm345_vm1, %v340_v4 }
  0xdc   : > { %v386_v12 = vpop.f32.mrf.mxu0 }
  0xdd   : > { %v398_v13 = vsel %vm397_vm3, %v386_v12, -1e+09 }
  0xde   : > { %v641_v14 = vpop.f32.mrf.mxu0  ;;  %v399_v15 = vsel %vm345_vm1, %v398_v13, -inf }
  0xdf   : > { %400 = vmax.xlane.f32.xlu0 %v399_v15 }
  0xe0   : > { %v389_v16 = vpop.f32.mrf.mxu0 }
  0xe2   : > { %v642_v17 = vpop.f32.mrf.mxu0 }
 0x168   : > { %v401_v18 = vpop.xlane.xlu0 %400 }
 0x169   : > { %v402_v19 = vsub.f32 %v398_v13, %v401_v18 }
 0x16b   : > { %v403_v20 = vmul.f32 1.442695, %v402_v19 }
 0x16d   : > { %692 = vpow2.f32 %v403_v20 }
 0x17a   : > { %v693_v21 = vpop.eup %692 }
 0x17b   : > { %v405_v22 = vsel %vm345_vm1, %v693_v21, 0.0 }
 0x17c   : > { %406 = vadd.xlane.f32.xlu0 %v405_v22 }
 0x205   : > { %v407_v25 = vpop.xlane.xlu0 %406 }
 0x206   : > { %694 = vrcp.f32 %v407_v25 }
 0x213   : > { %v695_v26 = vpop.eup %694 }
 0x214   : > { %v409_v27 = vmul.f32 %v695_v26, %v693_v21 }
 0x216   : > { %v410_v28 = vpack.c.bf16 %v409_v27, %v409_v27 }
 0x218   : > { %646 = vmatmul.mubr.msk.bf16.vlgmr.msra.gmra.mxu1 %vm345_vm1, %v410_v28 }
 0x2d8   : > { %v452_v29 = vpop.f32.mrf.mxu1 }
 0x2d9   : > { %v458_v30 = vpack.c.bf16 %v452_v29, %v452_v29 }
 0x2da   : > { %v647_v31 = vpop.f32.mrf.mxu1 }
 0x2db   : > { %460 = vst.msk [vmem:[%s336_s13] sm:$0xf] %vm459_vm5, %v458_v30 }
 0x2dc   : > { %v455_v32 = vpop.f32.mrf.mxu1 }
 0x2de   : > { %v648_v33 = vpop.f32.mrf.mxu1 }
 0x2df PF: > { %s14_s19 = sadd.s32 1, %s734_s19   ;;  %s840_s15 = smov %s726_s17 }
 0x2e0   : > { %p11_p7 = scmp.ge.s32.totalorder %s14_s19, 10   ;;  %s841_s16 = smov %s730_s18 }
 0x2e1   : > { %s842_s17 = smov %s845_s20  ;;  %s843_s18 = smov %s849_s21 }
 0x2e2   :  { %13 = sbr.rel (!%p11_p7) target bundleno = 3 (0x3), region = 75 }

// kernel: decoder_block_forward.9
= control target key start
LH: loop header
LB: loop body
LE: loop exit
PB: predicated region body
PF: predicated region fallthrough
CT: control target
= control target key end

     0   :  { %v293_v0 = vmov 0.0   ;;  %vm294_vm0 = vmmov 0   ;;  %vm62_vm1 = vcmask 261120   ;;  %vm234_vm2 = vcmask 257024   ;;  %s398_s1 = inlined_call_operand.vmem [shape: bf16[32,32], index: 1, kind: input, shape index: {}]   ;;  %s399_s0 = inlined_call_operand.vmem [shape: bf16[16,32], index: 0, kind: input, shape index: {}]   ;;  %s400_s2 = inlined_call_operand.vmem [shape: f32[1,32], index: 2, kind: input, shape index: {}]   ;;  %s401_s3 = inlined_call_operand.vmem [shape: f32[16,32], index: 3, kind: input, shape index: {}]   ;;  %s402_s6 = inlined_call_operand.vmem [shape: bf16[32,32], index: 6, kind: input, shape index: {}]   ;;  %s403_s4 = inlined_call_operand.vmem [shape: f32[1,32], index: 4, kind: input, shape index: {}]   ;;  %s404_s5 = inlined_call_operand.vmem [shape: f32[1,32], index: 5, kind: input, shape index: {}]   ;;  %s405_s8 = inlined_call_operand.vmem [shape: f32[16,32], index: 8, kind: output, shape index: {0}]   ;;  %s406_s7 = inlined_call_operand.vmem [shape: f32[1,32], index: 7, kind: input, shape index: {}]   ;;  %s407_s9 = inlined_call_operand.vmem [shape: bf16[16,32], index: 9, kind: output, shape index: {1}]  }
   0x1   :  { %266 = vmatprep.subr.bf16.mxu0 %v293_v0  ;;  %v284_v1 = vld [vmem:[%s398_s1 + $0x8] sm:$0xff]   ;;  %270 = vmatprep.mubr.msk.bf16.mxu0 %vm294_vm0, %v293_v0  ;;  %v285_v2 = vld [vmem:[%s398_s1] sm:$0xff]  }
   0x2   :  { %274 = vmatprep.subr.bf16.mxu1 %v293_v0  ;;  %278 = vmatprep.mubr.msk.bf16.mxu1 %vm294_vm0, %v293_v0  ;;  %v286_v3 = vld [vmem:[%s399_s0] sm:$0xff]   ;;  %v108_v11 = vld [vmem:[%s401_s3 + $0x8] sm:$0xff] }
   0x3   :  { %267 = vmatpush3.bf16.msra.mxu0 %v284_v1  ;;  %v245_v4 = vld [vmem:[%s400_s2] ss:$0 sm:$0xff]  ;;  %v287_v27 = vld [vmem:[%s402_s6 + $0x8] sm:$0xff]  }
   0x4   :  { %268 = vmatprep.subr.bf16.mxu0 %v293_v0  ;;  %v107_v6 = vld [vmem:[%s401_s3] sm:$0xff]  ;;  %275 = vmatpush3.bf16.msra.mxu1 %v287_v27 }
   0x5   :  { %v288_v28 = vld [vmem:[%s402_s6] sm:$0xff]   ;;  %276 = vmatprep.subr.bf16.mxu1 %v293_v0 }
   0x6   :  { %v250_v36 = vld [vmem:[%s403_s4] ss:$0 sm:$0xff] }
   0x7   :  { %269 = vmatpush3.bf16.msra.mxu0 %v285_v2  ;;  %v251_v38 = vld [vmem:[%s404_s5] ss:$0 sm:$0xff] }
   0x8   :  { %277 = vmatpush3.bf16.msra.mxu1 %v288_v28  ;;  %v252_v46 = vld [vmem:[%s406_s7] ss:$0 sm:$0xff] }
   0xa   :  { %271 = vmatmul.mubr.msk.bf16.vlgmr.msra.gmra.mxu0 %vm62_vm1, %v286_v3 }
  0xca   :  { %v100_v5 = vpop.f32.mrf.mxu0 }
  0xcb   :  { %v101_v7 = vadd.f32 %v245_v4, %v100_v5 }
  0xcc   :  { %v272_v8 = vpop.f32.mrf.mxu0 }
  0xcd   :  { %v109_v9 = vadd.f32 %v107_v6, %v101_v7 }
  0xce   :  { %v103_v10 = vpop.f32.mrf.mxu0 }
  0xcf   :  { %v104_v12 = vadd.f32 %v245_v4, %v103_v10  ;;  %v111_v13 = vsel %vm62_vm1, %v109_v9, 0.0 }
  0xd0   :  { %112 = vadd.xlane.f32.xlu0 %v111_v13  ;;  %v273_v14 = vpop.f32.mrf.mxu0 }
  0xd1   :  { %v110_v15 = vadd.f32 %v108_v11, %v104_v12 }
  0xd3   :  { %v114_v16 = vsel %vm62_vm1, %v110_v15, 0.0 }
  0xd4   :  { %115 = vadd.xlane.f32.xlu0 %v114_v16 }
 0x159   :  { %v113_v17 = vpop.xlane.xlu0 %112 }
 0x15a   :  { %v118_v18 = vmul.f32 0.03125, %v113_v17 }
 0x15c   :  { %v120_v19 = vsub.f32 %v109_v9, %v118_v18 }
 0x15d   :  { %v116_v20 = vpop.xlane.xlu0 %115 }
 0x15e   :  { %v119_v21 = vmul.f32 0.03125, %v116_v20  ;;  %v122_v22 = vmul.f32 %v120_v19, %v120_v19 }
 0x160   :  { %v121_v23 = vsub.f32 %v110_v15, %v119_v21  ;;  %v124_v24 = vsel %vm62_vm1, %v122_v22, 0.0 }
 0x161   :  { %125 = vadd.xlane.f32.xlu1 %v124_v24 }
 0x162   :  { %v123_v25 = vmul.f32 %v121_v23, %v121_v23 }
 0x164   :  { %v127_v26 = vsel %vm62_vm1, %v123_v25, 0.0 }
 0x165   :  { %128 = vadd.xlane.f32.xlu1 %v127_v26 }
 0x1ea   :  { %v126_v29 = vpop.xlane.xlu1 %125 }
 0x1eb   :  { %v130_v30 = vmul.f32 0.03125, %v126_v29 }
 0x1ed   :  { %v132_v31 = vadd.f32 1e-05, %v130_v30 }
 0x1ee   :  { %v129_v32 = vpop.xlane.xlu1 %128 }
 0x1ef   :  { %289 = vrsqrt.f32 %v132_v31  ;;  %v131_v33 = vmul.f32 0.03125, %v129_v32 }
 0x1f1   :  { %v133_v34 = vadd.f32 1e-05, %v131_v33 }
 0x1f3   :  { %291 = vrsqrt.f32 %v133_v34 }
 0x1fc   :  { %v290_v35 = vpop.eup %289 }
 0x1fd   :  { %v136_v37 = vmul.f32 %v290_v35, %v120_v19 }
 0x1ff   :  { %v145_v39 = vmul.f32 %v250_v36, %v136_v37 }
 0x200   :  { %v292_v40 = vpop.eup %291 }
 0x201   :  { %v137_v41 = vmul.f32 %v292_v40, %v121_v23  ;;  %v154_v42 = vadd.f32 %v251_v38, %v145_v39 }
 0x203   :  { %v146_v43 = vmul.f32 %v250_v36, %v137_v41  ;;  %156 = vst.msk [vmem:[%s405_s8] sm:$0xff] %vm62_vm1, %v154_v42 }
 0x205   :  { %v155_v44 = vadd.f32 %v251_v38, %v146_v43 }
 0x207   :  { %157 = vst.msk [vmem:[%s405_s8 + $0x8] sm:$0xff] %vm62_vm1, %v155_v44  ;;  %v158_v45 = vpack.c.bf16 %v155_v44, %v154_v42 }
 0x209   :  { %279 = vmatmul.mubr.msk.bf16.vlgmr.msra.gmra.mxu1 %vm62_vm1, %v158_v45 }
 0x2c9   :  { %v219_v47 = vpop.f32.mrf.mxu1 }
 0x2ca   :  { %v220_v48 = vadd.f32 %v252_v46, %v219_v47 }
 0x2cb   :  { %v280_v49 = vpop.f32.mrf.mxu1 }
 0x2cc   :  { %v258_v50 = vpack.c.bf16 %v220_v48, %v220_v48 }
 0x2cd   :  { %v222_v51 = vpop.f32.mrf.mxu1 }
 0x2ce   :  { %235 = vst.msk [vmem:[%s407_s9] sm:$0xf] %vm234_vm2, %v258_v50  ;;  %v223_v52 = vadd.f32 %v252_v46, %v222_v51 }
 0x2cf   :  { %v281_v53 = vpop.f32.mrf.mxu1 }
 0x2d0   :  { %v259_v54 = vpack.c.bf16 %v223_v52, %v223_v52 }
 0x2d2   :  { %236 = vst.msk [vmem:[%s407_s9 + $0x4] sm:$0xf] %vm234_vm2, %v259_v54 }

// kernel: decoder_block_forward.10
= control target key start
LH: loop header
LB: loop body
LE: loop exit
PB: predicated region body
PF: predicated region fallthrough
CT: control target
= control target key end

     0   :  { %vm19_vm0 = vcmask 523264   ;;  %v145_v0 = vmov 0.0   ;;  %vm146_vm1 = vmmov 0   ;;  %vm43_vm2 = vcmask 261120   ;;  %s192_s1 = inlined_call_operand.vmem [shape: bf16[32,64], index: 1, kind: input, shape index: {}]   ;;  %s193_s0 = inlined_call_operand.vmem [shape: f32[16,32], index: 0, kind: input, shape index: {}]   ;;  %s194_s2 = inlined_call_operand.vmem [shape: f32[1,64], index: 2, kind: input, shape index: {}]   ;;  %s195_s3 = inlined_call_operand.vmem [shape: bf16[16,64], index: 3, kind: output, shape index: {}]  }
   0x1   :  { %133 = vmatprep.subr.bf16.mxu0 %v145_v0  ;;  %v143_v1 = vld [vmem:[%s192_s1 + $0x8] sm:$0xff]   ;;  %137 = vmatprep.mubr.msk.bf16.mxu0 %vm146_vm1, %v145_v0  ;;  %20 = vst.msk [vmem:[#allocation2] sm:$0xff] %vm19_vm0, %v145_v0  ;;  %21 = vst.msk [vmem:[#allocation2 + $0x8] sm:$0xff] %vm19_vm0, %v145_v0  ;;  %v144_v2 = vld [vmem:[%s192_s1] sm:$0xff]   ;;  %vm115_vm3 = vcmask 519168  }
   0x2   :  { %134 = vmatpush3.bf16.msra.mxu0 %v143_v1  ;;  %v24_v3 = vld [vmem:[%s193_s0] sm:$0xff]  ;;  %v25_v4 = vld [vmem:[%s193_s0 + $0x8] sm:$0xff] }
   0x3   :  { %135 = vmatprep.subr.bf16.mxu0 %v145_v0  ;;  %v26_v5 = vpack.c.bf16 %v25_v4, %v24_v3  ;;  %v125_v14 = vld [vmem:[%s194_s2] ss:$0 sm:$0xff] }
   0x6   :  { %136 = vmatpush3.bf16.msra.mxu0 %v144_v2 }
   0x8   :  { %v22_v6 = vld [vmem:[#allocation2] sm:$0xff]  ;;  %v23_v10 = vld [vmem:[#allocation2 + $0x8] sm:$0xff] }
   0x9   :  { %138 = vmatmul.mubr.msk.bf16.vlgmr.msra.gmra.mxu0 %vm43_vm2, %v26_v5 }
  0xc9   :  { %v81_v7 = vpop.f32.mrf.mxu0 }
  0xca   :  { %v88_v8 = vadd.f32 %v81_v7, %v22_v6 }
  0xcb   :  { %v139_v9 = vpop.f32.mrf.mxu0 }
  0xcc   :  { %91 = vst.msk [vmem:[#allocation2] sm:$0xff] %vm19_vm0, %v88_v8 }
  0xcd   :  { %v84_v11 = vpop.f32.mrf.mxu0 }
  0xce   :  { %v89_v12 = vadd.f32 %v84_v11, %v23_v10 }
  0xcf   :  { %v140_v13 = vpop.f32.mrf.mxu0 }
  0xd0   :  { %92 = vst.msk [vmem:[#allocation2 + $0x8] sm:$0xff] %vm19_vm0, %v89_v12 }
  0xd3   :  { %v96_v15 = vld [vmem:[#allocation2] sm:$0xff] }
  0xd4   :  { %v105_v16 = vadd.f32 %v125_v14, %v96_v15 }
  0xd6   :  { %v128_v17 = vpack.c.bf16 %v105_v16, %v105_v16 }
  0xd7   :  { %v97_v18 = vld [vmem:[#allocation2 + $0x8] sm:$0xff] }
  0xd8   :  { %116 = vst.msk [vmem:[%s195_s3] sm:$0xf] %vm115_vm3, %v128_v17  ;;  %v106_v19 = vadd.f32 %v125_v14, %v97_v18 }
  0xda   :  { %v129_v20 = vpack.c.bf16 %v106_v19, %v106_v19 }
  0xdc   :  { %117 = vst.msk [vmem:[%s195_s3 + $0x4] sm:$0xf] %vm115_vm3, %v129_v20 }

// kernel: decoder_block_forward.12
= control target key start
LH: loop header
LB: loop body
LE: loop exit
PB: predicated region body
PF: predicated region fallthrough
CT: control target
= control target key end

     0   :  { %v181_v0 = vmov 0.0   ;;  %vm182_vm0 = vmmov 0   ;;  %vm54_vm1 = vcmask 261120   ;;  %s255_s1 = inlined_call_operand.vmem [shape: bf16[32,32], index: 1, kind: input, shape index: {}]   ;;  %s256_s0 = inlined_call_operand.vmem [shape: bf16[16,32], index: 0, kind: input, shape index: {}]   ;;  %s257_s2 = inlined_call_operand.vmem [shape: f32[1,32], index: 2, kind: input, shape index: {}]   ;;  %s258_s3 = inlined_call_operand.vmem [shape: f32[16,32], index: 3, kind: input, shape index: {}]   ;;  %s259_s4 = inlined_call_operand.vmem [shape: f32[1,32], index: 4, kind: input, shape index: {}]   ;;  %s260_s5 = inlined_call_operand.vmem [shape: f32[1,32], index: 5, kind: input, shape index: {}]   ;;  %s261_s6 = inlined_call_operand.vmem [shape: f32[16,32], index: 6, kind: output, shape index: {}]  }
   0x1   :  { %164 = vmatprep.subr.bf16.mxu0 %v181_v0  ;;  %v174_v1 = vld [vmem:[%s255_s1 + $0x8] sm:$0xff]   ;;  %168 = vmatprep.mubr.msk.bf16.mxu0 %vm182_vm0, %v181_v0  ;;  %v175_v2 = vld [vmem:[%s255_s1] sm:$0xff]  }
   0x2   :  { %165 = vmatpush3.bf16.msra.mxu0 %v174_v1  ;;  %v176_v3 = vld [vmem:[%s256_s0] sm:$0xff]   ;;  %v100_v11 = vld [vmem:[%s258_s3 + $0x8] sm:$0xff] }
   0x3   :  { %166 = vmatprep.subr.bf16.mxu0 %v181_v0  ;;  %v154_v4 = vld [vmem:[%s257_s2] ss:$0 sm:$0xff] }
   0x4   :  { %v99_v6 = vld [vmem:[%s258_s3] sm:$0xff] }
   0x5   :  { %v159_v34 = vld [vmem:[%s259_s4] ss:$0 sm:$0xff] }
   0x6   :  { %167 = vmatpush3.bf16.msra.mxu0 %v175_v2  ;;  %v160_v36 = vld [vmem:[%s260_s5] ss:$0 sm:$0xff] }
   0x9   :  { %169 = vmatmul.mubr.msk.bf16.vlgmr.msra.gmra.mxu0 %vm54_vm1, %v176_v3 }
  0xc9   :  { %v92_v5 = vpop.f32.mrf.mxu0 }
  0xca   :  { %v93_v7 = vadd.f32 %v154_v4, %v92_v5 }
  0xcb   :  { %v170_v8 = vpop.f32.mrf.mxu0 }
  0xcc   :  { %v101_v9 = vadd.f32 %v99_v6, %v93_v7 }
  0xcd   :  { %v95_v10 = vpop.f32.mrf.mxu0 }
  0xce   :  { %v96_v12 = vadd.f32 %v154_v4, %v95_v10  ;;  %v103_v13 = vsel %vm54_vm1, %v101_v9, 0.0 }
  0xcf   :  { %104 = vadd.xlane.f32.xlu0 %v103_v13  ;;  %v171_v14 = vpop.f32.mrf.mxu0 }
  0xd0   :  { %v102_v15 = vadd.f32 %v100_v11, %v96_v12 }
  0xd2   :  { %v106_v16 = vsel %vm54_vm1, %v102_v15, 0.0 }
  0xd3   :  { %107 = vadd.xlane.f32.xlu0 %v106_v16 }
 0x158   :  { %v105_v17 = vpop.xlane.xlu0 %104 }
 0x159   :  { %v110_v18 = vmul.f32 0.03125, %v105_v17 }
 0x15b   :  { %v112_v19 = vsub.f32 %v101_v9, %v110_v18 }
 0x15c   :  { %v108_v20 = vpop.xlane.xlu0 %107 }
 0x15d   :  { %v111_v21 = vmul.f32 0.03125, %v108_v20  ;;  %v114_v22 = vmul.f32 %v112_v19, %v112_v19 }
 0x15f   :  { %v113_v23 = vsub.f32 %v102_v15, %v111_v21  ;;  %v116_v24 = vsel %vm54_vm1, %v114_v22, 0.0 }
 0x160   :  { %117 = vadd.xlane.f32.xlu1 %v116_v24 }
 0x161   :  { %v115_v25 = vmul.f32 %v113_v23, %v113_v23 }
 0x163   :  { %v119_v26 = vsel %vm54_vm1, %v115_v25, 0.0 }
 0x164   :  { %120 = vadd.xlane.f32.xlu1 %v119_v26 }
 0x1e9   :  { %v118_v27 = vpop.xlane.xlu1 %117 }
 0x1ea   :  { %v122_v28 = vmul.f32 0.03125, %v118_v27 }
 0x1ec   :  { %v124_v29 = vadd.f32 1e-05, %v122_v28 }
 0x1ed   :  { %v121_v30 = vpop.xlane.xlu1 %120 }
 0x1ee   :  { %177 = vrsqrt.f32 %v124_v29  ;;  %v123_v31 = vmul.f32 0.03125, %v121_v30 }
 0x1f0   :  { %v125_v32 = vadd.f32 1e-05, %v123_v31 }
 0x1f2   :  { %179 = vrsqrt.f32 %v125_v32 }
 0x1fb   :  { %v178_v33 = vpop.eup %177 }
 0x1fc   :  { %v128_v35 = vmul.f32 %v178_v33, %v112_v19 }
 0x1fe   :  { %v137_v37 = vmul.f32 %v159_v34, %v128_v35 }
 0x1ff   :  { %v180_v38 = vpop.eup %179 }
 0x200   :  { %v146_v39 = vadd.f32 %v160_v36, %v137_v37  ;;  %v129_v40 = vmul.f32 %v180_v38, %v113_v23 }
 0x202   :  { %148 = vst.msk [vmem:[%s261_s6] sm:$0xff] %vm54_vm1, %v146_v39  ;;  %v138_v41 = vmul.f32 %v159_v34, %v129_v40 }
 0x204   :  { %v147_v42 = vadd.f32 %v160_v36, %v138_v41 }
 0x206   :  { %149 = vst.msk [vmem:[%s261_s6 + $0x8] sm:$0xff] %vm54_vm1, %v147_v42 }

// kernel: decoder_block_forward.11
= control target key start
LH: loop header
LB: loop body
LE: loop exit
PB: predicated region body
PF: predicated region fallthrough
CT: control target
= control target key end

     0   :  { %s1100_s0 = inlined_call_operand.vmem [shape: bf16[2,4,8,8], index: 0, kind: input, shape index: {}]   ;;  %s1101_s1 = inlined_call_operand.vmem [shape: bf16[2,2,4,8,8], index: 1, kind: input, shape index: {}, may-alias: {1,2}]   ;;  %s1102_s2 = inlined_call_operand.vmem [shape: bf16[2,2,4,8,8], index: 2, kind: input, shape index: {}, may-alias: {1,2}]   ;;  %s1103_s3 = inlined_call_operand.vmem [shape: f32[2,1,8], index: 3, kind: input, shape index: {}]   ;;  %s1104_s4 = inlined_call_operand.vmem [shape: bf16[2,4,8,8], index: 4, kind: output, shape index: {0}]   ;;  %s1105_s5 = inlined_call_operand.hbm [shape: f32[2,4,8,8], index: 5, kind: output, shape index: {1}]  }
   0x1   :  { %1106 = sst [smem:[#allocation5_spill]] %s1100_s0 }
   0x2   :  { %1107 = sst [smem:[#allocation6_spill]] %s1101_s1 }
   0x3   :  { %1108 = sst [smem:[#allocation7_spill]] %s1102_s2 }
   0x4   :  { %11 = vsyncpa [#allocation3], 0 }
   0x5   :  { %13 = vsyncpa [#allocation3 + $0x1], 0  ;;  %s952_s18 = smov 0   ;;  %s954_s19 = smov 0  }
   0x6   :  { %s956_s20 = smov 0   ;;  %s958_s21 = smov 0  }
   0x7   :  { %s960_s22 = smov 0   ;;  %s962_s23 = smov 0  }
   0x8   :  { %s964_s24 = smov 0   ;;  %s966_s25 = smov 0  }
   0x9 LB: > { %s708_s26 = sadd.s32 4294967295, %s916_s25   ;;  %s709_s27 = sadd.s32 4294967294, %s916_s25   ;;  %s916_s25 = sphi %s966_s25, %s19_s25   ;;  %s912_s24 = sphi %s964_s24, %s1120_s24   ;;  %s908_s23 = sphi %s962_s23, %s1119_s23   ;;  %s904_s22 = sphi %s960_s22, %s1118_s22   ;;  %s900_s21 = sphi %s958_s21, %s1117_s21   ;;  %s896_s20 = sphi %s956_s20, %s1116_s20   ;;  %s892_s19 = sphi %s954_s19, %s1115_s19   ;;  %s888_s18 = sphi %s952_s18, %s1114_s18  }
   0xa   : > { %s34_s28 = sadd.s32 1, %s908_s23  ;;  %s38_s29 = sadd.s32 1, %s912_s24 }
   0xb   : > { %p36_p0 = scmp.ge.s32.totalorder %s34_s28, 4  ;;  %p201_p1 = scmp.ne.s32.totalorder %s896_s20, %s892_s19 }
   0xc   : > { %p202_p2 = scmp.eq.s32.totalorder %s708_s26, 7  ;;  %p207_p5 = scmp.ne.s32.totalorder %s892_s19, %s888_s18 }
   0xd   : > { %s1122_s28 = smov (%p36_p0, %s34_s28), 0  ;;  %s1124_s29 = smov (!%p36_p0, %s38_s29), %s912_s24 }
   0xe   : > { %s185_s30 = ssub.s32 %s908_s23, %s1122_s28  ;;  %p1003_p3 = por %p202_p2, %p201_p1 }
   0xf   : > { %p40_p4 = scmp.ge.s32.totalorder %s1124_s29, 2  ;;  %p208_p6 = scmp.eq.s32.totalorder %s709_s27, 7 }
  0x10   : > { %p712_p7 = scmp.ge.s32.totalorder %s916_s25, 1  ;;  %p269_p9 = scmp.lt.s32.totalorder %s916_s25, 9 }
  0x11   : > { %s1126_s29 = smov (%p40_p4, %s1124_s29), 0  ;;  %p1012_p8 = por %p208_p6, %p207_p5 }
  0x12   : > { %s184_s8 = ssub.s32 %s912_s24, %s1126_s29  ;;  %s191_s9 = sadd.s32 1, %s896_s20 }
  0x13   : > { %s186_s10 = sor.u32 %s185_s30, %s184_s8  ;;  %p270_p10 = pnand %p712_p7, %p269_p9 }
  0x14   : > { %p189_p11 = scmp.eq.s32.totalorder %s186_s10, 0  ;;  %p334_p12 = scmp.lt.s32.totalorder (!%p270_p10), %s904_s22, 1 }
  0x15   : > { %273 = sbr.rel (%p270_p10) target bundleno = 748 (0x2ec), region = 36  ;;  %p336_p13 = scmp.lt.s32.totalorder (!%p270_p10), %s900_s21, 3 }
  0x16   : > { %s1021_s11 = scalar_select %p189_p11, %s896_s20, %s191_s9  }
  0x17   : > { %s1111_s1 = sld [smem:[#allocation6_spill]] (!%p270_p10)  ;;  %s331_s26 = sand.u32 (!%p270_p10), 1, %s892_s19  }
  0x18   : > { %s1112_s0 = sld [smem:[#allocation5_spill]] (!%p270_p10)  ;;  %s726_s8 = sshll.u32 (!%p270_p10), %s904_s22, 2 }
  0x19   : > { %s1113_s2 = sld [smem:[#allocation7_spill]] (!%p270_p10) }
  0x1a   : > { %v918_v0 = vmov 0.0   ;;  %vm919_vm0 = vmmov 0   ;;  %s335_s12 = scalar_select %p334_p12, %s904_s22, 1  ;;  %vm384_vm1 = vcmask 64512   ;;  %v432_v5 = vlaneseq }
  0x1b   : > { %734 = vmatprep.subr.bf16.mxu0 %v918_v0  ;;  %736 = vmatprep.mubr.msk.bf16.mxu0 %vm919_vm0, %v918_v0  ;;  %s337_s13 = scalar_select %p336_p13, %s900_s21, 3  ;;  %v920_v9 = vmov 0   ;;  %vm454_vm4 = vcmask 1043456  }
  0x1c   : > { %740 = vmatprep.subr.bf16.mxu1 %v918_v0  ;;  %742 = vmatprep.mubr.msk.bf16.mxu1 %vm919_vm0, %v918_v0  ;;  %s714_s14 = sshll.u32 %s335_s12, 2  ;;  %v433_v7 = vshrl.u32 %v432_v5, 7 }
  0x1d   : > { %s342_s15 = sadd.s32 %s714_s14, %s337_s13  ;;  %s364_s14 = scalar_lea.vmem %s1103_s3, %s335_s12 }
  0x1e   : > { %s1027_s16 = sshll.u32 %s342_s15, 2  ;;  %v382_v6 = vld [vmem:[%s364_s14] sm:$0x1]  ;;  %v434_v8 = vsub.s32 0, %v433_v7 }
  0x1f   : > { %s352_s27 = scalar_lea.vmem %s1111_s1, %s1027_s16  ;;  %s344_s9 = scalar_lea.vmem %s1112_s0, %s1027_s16  ;;  %vm383_vm2 = vcmp.gt.f32.partialorder %v382_v6, 0.0 }
  0x20   : > { %v380_v1 = vld [vmem:[%s352_s27] sm:$0xf]  ;;  %v431_v10 = vsel %vm383_vm2, 1, %v920_v9  ;;  %s617_s17 = scalar_lea.vmem %s1113_s2, %s1027_s16  ;;  %s713_s27 = sshll.u32 %s331_s26, 3 }
  0x21   : > { %v389_v2 = vsel %vm384_vm1, %v380_v1, 0  ;;  %v378_v3 = vld [vmem:[%s344_s9] sm:$0xf]  ;;  %v435_v11 = vrot.slane %v431_v10, %v434_v8  ;;  %s333_s30 = scalar_lea.vmem [#allocation2], %s713_s27  ;;  %s528_s9 = sadd.s32 %s900_s21, %s726_s8 }
  0x22   : > { %735 = vmatpush3.bf16.xpose.msra.mxu0 %v389_v2  ;;  %v379_v4 = vmul.bf16 1052065461, %v378_v3  ;;  %v722_v23 = vld [vmem:[%s617_s17 + $0x20] sm:$0xf]  ;;  %s727_s10 = sshll.u32 %s528_s9, 7  ;;  %s532_s13 = sshll.u32 %s333_s30, 4  ;;  %s533_s13 = int_to_ptr.vmem [resolvable:$true] %s532_s13 }
  0x23   : > { %vm436_vm3 = vcmp.eq.s32.totalorder %v435_v11, 1  ;;  %v456_v24 = vsel %vm454_vm4, %v722_v23, 0  ;;  %s530_s15 = scalar_lea.hbm %s1105_s5, %s727_s10  ;;  %s513_s17 = scalar_lea.sflag [#allocation3], %s331_s26 }
  0x24   : > { %741 = vmatpush3.bf16.msra.mxu1 %v456_v24  ;;  %s824_s0 = scalar_lea.vmem %s533_s13, 128  ;;  %s921_s27 = smov [#allocation2]  }
  0x25   : > { %p825_p0 = scmp.ne.s32.totalorder %s533_s13, %s824_s0  ;;  %s828_s1 = sshll.u32 %s921_s27, 4  ;;  %s829_s1 = int_to_ptr.vmem [resolvable:$false] %s828_s1 }
  0x26   : > { %s830_s2 = scalar_lea.vmem %s829_s1, 256  ;;  %p831_p4 = scmp.lt.s32.totalorder %s533_s13, %s829_s1 }
  0x27   : > { %p826_p1 = pnand %p825_p0, %p1003_p3  ;;  %p832_p5 = scmp.lt.s32.totalorder %s830_s2, %s824_s0 }
  0x29   : > { %737 = vmatmul.mubr.msk.bf16.vlgmr.msra.gmra.mxu0 %vm384_vm1, %v379_v4  ;;  %p827_p2 = pneg %p826_p1  ;;  %p833_p6 = por %p832_p5, %p831_p4 }
  0x2b   : > { %p834_p7 = pnand %p833_p6, %p827_p2 }
  0xe9   : > { %v425_v12 = vpop.f32.mrf.mxu0 }
  0xea   : > { %v437_v13 = vsel %vm436_vm3, %v425_v12, -1e+09 }
  0xeb   : > { %v738_v14 = vpop.f32.mrf.mxu0  ;;  %v438_v15 = vsel %vm384_vm1, %v437_v13, -inf }
  0xec   : > { %439 = vmax.xlane.f32.xlu0 %v438_v15 }
  0xed   : > { %v428_v16 = vpop.f32.mrf.mxu0 }
  0xef   : > { %v739_v17 = vpop.f32.mrf.mxu0 }
 0x175   : > { %v440_v18 = vpop.xlane.xlu0 %439 }
 0x176   : > { %v441_v19 = vsub.f32 %v437_v13, %v440_v18 }
 0x178   : > { %v442_v20 = vmul.f32 1.442695, %v441_v19 }
 0x17a   : > { %820 = vpow2.f32 %v442_v20 }
 0x187   : > { %v821_v21 = vpop.eup %820 }
 0x188   : > { %v444_v22 = vsel %vm384_vm1, %v821_v21, 0.0 }
 0x189   : > { %445 = vadd.xlane.f32.xlu0 %v444_v22 }
 0x212   : > { %v446_v25 = vpop.xlane.xlu0 %445 }
 0x213   : > { %822 = vrcp.f32 %v446_v25 }
 0x220   : > { %v823_v26 = vpop.eup %822 }
 0x221   : > { %v448_v27 = vmul.f32 %v823_v26, %v821_v21 }
 0x223   : > { %v450_v28 = vpack.c.bf16 %v448_v27, %v448_v27  ;;  %449 = vst.msk [vmem:[%s333_s30] sm:$0xff] %vm384_vm1, %v448_v27 }
 0x225   : > { %743 = vmatmul.mubr.msk.bf16.vlgmr.msra.gmra.mxu1 %vm384_vm1, %v450_v28 }
 0x226   : > { %837 = shalt.err (!%p834_p7)
}
 0x227   : > { %s838_s21 = scalar_lea.hbm %s530_s15, 128  ;;  %s842_s30 = scalar_lea.hbm %s1105_s5, 1024 }
 0x228   : > { %p839_p9 = scmp.ne.s32.totalorder %s530_s15, %s838_s21  ;;  %p843_p12 = scmp.lt.s32.totalorder %s530_s15, %s1105_s5 }
 0x229   : > { %p844_p13 = scmp.lt.s32.totalorder %s842_s30, %s838_s21 }
 0x22a   : > { %p840_p10 = pnand %p839_p9, %p1003_p3 }
 0x22b   : > { %p845_p0 = por %p844_p13, %p843_p12 }
 0x22c   : > { %p841_p11 = pneg %p840_p10 }
 0x22e   : > { %p846_p1 = pnand %p845_p0, %p841_p11 }
 0x230   : > { %849 = shalt.err (!%p846_p1)
}
 0x231   : > { %746 = dma.vmem_to_hbm [thread:$0]  (%p1003_p3), %s533_s13, 128, %s530_s15, %s513_s17   ;;  %vm499_vm5 = vcmask 60416  }
 0x232   : > { %s375_s2 = scalar_lea.vmem %s1104_s4, %s1027_s16 }
 0x2e5   : > { %v492_v29 = vpop.f32.mrf.mxu1 }
 0x2e6   : > { %v498_v30 = vpack.c.bf16 %v492_v29, %v492_v29 }
 0x2e7   : > { %v744_v31 = vpop.f32.mrf.mxu1 }
 0x2e8   : > { %500 = vst.msk [vmem:[%s375_s2] sm:$0xf] %vm499_vm5, %v498_v30 }
 0x2e9   : > { %v495_v32 = vpop.f32.mrf.mxu1 }
 0x2eb   : > { %v745_v33 = vpop.f32.mrf.mxu1 }
 0x2ec PF: > { %p752_p2 = scmp.ge.s32.totalorder %s916_s25, 2  ;;  %s558_s10 = sand.u32 1, %s888_s18  }
 0x2ed   : > { %s559_s6 = scalar_lea.sflag [#allocation3], %s558_s10 }
 0x2ee   : > { %p749_p4 = pnand %p752_p2, %p1012_p8 }
 0x2f0   : > { %p750_p3 = pneg %p749_p4 }
 0x2f2   : > { %883 = dma.done.wait (%p750_p3), %s559_s6, 128  }
 0x2f3   : > { %885 = vsyncadd (%p750_p3), %s559_s6, 4294967168  ;;  %s19_s25 = sadd.s32 1, %s916_s25   ;;  %s1114_s18 = smov %s892_s19 }
 0x2f4   : > { %p16_p5 = scmp.ge.s32.totalorder %s19_s25, 10   ;;  %s1115_s19 = smov %s896_s20 }
 0x2f5   : > { %s1116_s20 = smov %s1021_s11  ;;  %s1117_s21 = smov %s908_s23 }
 0x2f6   : > { %s1118_s22 = smov %s912_s24  ;;  %s1119_s23 = smov %s1122_s28 }
 0x2f7   : > { %s1120_s24 = smov %s1126_s29  ;;  %18 = sbr.rel (!%p16_p5) target bundleno = 9 (0x9), region = 92 }
 0x2fc   :  { %564 = vsyncpa [#allocation3], 1 }
 0x2fd   :  { %566 = vsyncpa [#allocation3 + $0x1], 1 }

// kernel: decoder_block_forward.13
= control target key start
LH: loop header
LB: loop body
LE: loop exit
PB: predicated region body
PF: predicated region fallthrough
CT: control target
= control target key end

     0   :  { %v350_v1 = vmov 0.0   ;;  %vm351_vm0 = vmmov 0   ;;  %vm32_vm1 = vcmask 261120   ;;  %s445_s0 = inlined_call_operand.vmem [shape: f32[16,32], index: 0, kind: input, shape index: {}]   ;;  %s446_s1 = inlined_call_operand.vmem [shape: bf16[32,64], index: 1, kind: input, shape index: {}]   ;;  %s447_s2 = inlined_call_operand.vmem [shape: f32[1,64], index: 2, kind: input, shape index: {}]   ;;  %s448_s3 = inlined_call_operand.vmem [shape: bf16[64,32], index: 3, kind: input, shape index: {}]   ;;  %s449_s4 = inlined_call_operand.vmem [shape: f32[1,32], index: 4, kind: input, shape index: {}]   ;;  %s450_s5 = inlined_call_operand.vmem [shape: f32[1,32], index: 5, kind: input, shape index: {}]   ;;  %s451_s6 = inlined_call_operand.vmem [shape: f32[1,32], index: 6, kind: input, shape index: {}]   ;;  %s452_s7 = inlined_call_operand.hbm [shape: f32[16,32], index: 7, kind: output, shape index: {}]  }
   0x1   :  { %v318_v0 = vld [vmem:[%s446_s1 + $0x8] sm:$0xff]   ;;  %293 = vmatprep.subr.bf16.mxu0 %v350_v1  ;;  %v319_v2 = vld [vmem:[%s446_s1] sm:$0xff]   ;;  %301 = vmatprep.subr.bf16.mxu1 %v350_v1  ;;  %33 = vst.msk [vmem:[#allocation2] sm:$0xff] %vm32_vm1, %v350_v1  ;;  %34 = vst.msk [vmem:[#allocation2 + $0x8] sm:$0xff] %vm32_vm1, %v350_v1 }
   0x2   :  { %294 = vmatpush3.bf16.msra.mxu0 %v318_v0  ;;  %297 = vmatprep.mubr.msk.bf16.mxu0 %vm351_vm0, %v350_v1  ;;  %v35_v3 = vld [vmem:[%s445_s0] sm:$0xff]  ;;  %v36_v4 = vld [vmem:[%s445_s0 + $0x8] sm:$0xff]  ;;  %v320_v5 = vld [vmem:[%s448_s3 + $0x18] sm:$0xff]  }
   0x3   :  { %295 = vmatprep.subr.bf16.mxu0 %v350_v1  ;;  %309 = vmatprep.mubr.msk.bf16.mxu1 %vm351_vm0, %v350_v1  ;;  %v37_v6 = vpack.c.bf16 %v36_v4, %v35_v3 }
   0x4   :  { %302 = vmatpush3.bf16.msra.mxu1 %v320_v5 }
   0x5   :  { %303 = vmatprep.subr.bf16.mxu1 %v350_v1 }
   0x6   :  { %296 = vmatpush3.bf16.msra.mxu0 %v319_v2 }
   0x7   :  { %12 = vsyncpa [#allocation4], 0  ;;  %v321_v7 = vld [vmem:[%s448_s3 + $0x10] sm:$0xff]   ;;  %v322_v8 = vld [vmem:[%s448_s3 + $0x8] sm:$0xff]   ;;  %vm143_vm2 = vcmask 523264   ;;  %s352_s20 = smov [#allocation3]  }
   0x8   :  { %304 = vmatpush3.bf16.msra.mxu1 %v321_v7  ;;  %v323_v9 = vld [vmem:[%s448_s3] sm:$0xff]   ;;  %v109_v24 = vld [vmem:[#allocation2 + $0x8] sm:$0xff]  ;;  %s262_s21 = sshll.u32 %s352_s20, 4  ;;  %s263_s21 = int_to_ptr.vmem [resolvable:$true] %s262_s21 }
   0x9   :  { %298 = vmatmul.mubr.msk.bf16.vlgmr.msra.gmra.mxu0 %vm32_vm1, %v37_v6  ;;  %305 = vmatprep.subr.bf16.mxu1 %v350_v1  ;;  %v273_v10 = vld [vmem:[%s447_s2] ss:$0 sm:$0xff]  ;;  %s328_s22 = scalar_lea.vmem %s263_s21, 256  ;;  %p333_p1 = scmp.lt.s32.totalorder %s263_s21, %s263_s21 }
   0xa   :  { %v108_v20 = vld [vmem:[#allocation2] sm:$0xff]  ;;  %p329_p0 = scmp.ne.s32.totalorder %s263_s21, %s328_s22  ;;  %p334_p2 = scmp.lt.s32.totalorder %s328_s22, %s328_s22 }
   0xb   :  { %v282_v28 = vld [vmem:[%s449_s4] ss:$0 sm:$0xff] }
   0xc   :  { %306 = vmatpush3.bf16.msra.mxu1 %v322_v8  ;;  %v283_v54 = vld [vmem:[%s450_s5] ss:$0 sm:$0xff]  ;;  %p335_p3 = por %p334_p2, %p333_p1 }
   0xd   :  { %307 = vmatprep.subr.bf16.mxu1 %v350_v1  ;;  %v284_v56 = vld [vmem:[%s451_s6] ss:$0 sm:$0xff] }
   0xe   :  { %p336_p4 = pnand %p335_p3, %p329_p0 }
  0x10   :  { %308 = vmatpush3.bf16.msra.mxu1 %v323_v9 }
  0xc9   :  { %v99_v11 = vpop.f32.mrf.mxu0 }
  0xca   :  { %v100_v13 = vadd.f32 %v273_v10, %v99_v11 }
  0xcb   :  { %v299_v12 = vpop.f32.mrf.mxu0 }
  0xcc   :  { %v106_v17 = vmax.f32 %v100_v13, 0.0 }
  0xcd   :  { %v102_v14 = vpop.f32.mrf.mxu0 }
  0xce   :  { %v103_v15 = vadd.f32 %v273_v10, %v102_v14 }
  0xcf   :  { %v300_v16 = vpop.f32.mrf.mxu0 }
  0xd0   :  { %v107_v18 = vmax.f32 %v103_v15, 0.0 }
  0xd2   :  { %v110_v19 = vpack.c.bf16 %v107_v18, %v106_v17 }
  0xd4   :  { %310 = vmatmul.mubr.msk.bf16.vlgmr.msra.gmra.mxu1 %vm143_vm2, %v110_v19 }
 0x194   :  { %v181_v21 = vpop.f32.mrf.mxu1 }
 0x195   :  { %v188_v22 = vadd.f32 %v181_v21, %v108_v20 }
 0x196   :  { %v311_v23 = vpop.f32.mrf.mxu1 }
 0x197   :  { %190 = vst.msk [vmem:[#allocation2] sm:$0xff] %vm32_vm1, %v188_v22 }
 0x198   :  { %v184_v25 = vpop.f32.mrf.mxu1 }
 0x199   :  { %v189_v26 = vadd.f32 %v184_v25, %v109_v24 }
 0x19a   :  { %v312_v27 = vpop.f32.mrf.mxu1 }
 0x19b   :  { %191 = vst.msk [vmem:[#allocation2 + $0x8] sm:$0xff] %vm32_vm1, %v189_v26 }
 0x19e   :  { %v195_v29 = vld [vmem:[#allocation2] sm:$0xff] }
 0x19f   :  { %v204_v30 = vadd.f32 %v282_v28, %v195_v29 }
 0x1a1   :  { %v208_v31 = vadd.f32 %v204_v30, %v35_v3 }
 0x1a2   :  { %v196_v32 = vld [vmem:[#allocation2 + $0x8] sm:$0xff] }
 0x1a3   :  { %v210_v33 = vsel %vm32_vm1, %v208_v31, 0.0  ;;  %v205_v34 = vadd.f32 %v282_v28, %v196_v32 }
 0x1a4   :  { %211 = vadd.xlane.f32.xlu0 %v210_v33 }
 0x1a5   :  { %v209_v35 = vadd.f32 %v205_v34, %v36_v4 }
 0x1a7   :  { %v213_v36 = vsel %vm32_vm1, %v209_v35, 0.0 }
 0x1a8   :  { %214 = vadd.xlane.f32.xlu0 %v213_v36 }
 0x22d   :  { %v212_v37 = vpop.xlane.xlu0 %211 }
 0x22e   :  { %v217_v38 = vmul.f32 0.03125, %v212_v37 }
 0x230   :  { %v219_v39 = vsub.f32 %v208_v31, %v217_v38 }
 0x231   :  { %v215_v40 = vpop.xlane.xlu0 %214 }
 0x232   :  { %v218_v41 = vmul.f32 0.03125, %v215_v40  ;;  %v221_v42 = vmul.f32 %v219_v39, %v219_v39 }
 0x234   :  { %v220_v43 = vsub.f32 %v209_v35, %v218_v41  ;;  %v223_v44 = vsel %vm32_vm1, %v221_v42, 0.0 }
 0x235   :  { %224 = vadd.xlane.f32.xlu1 %v223_v44 }
 0x236   :  { %v222_v45 = vmul.f32 %v220_v43, %v220_v43 }
 0x238   :  { %v226_v46 = vsel %vm32_vm1, %v222_v45, 0.0 }
 0x239   :  { %227 = vadd.xlane.f32.xlu1 %v226_v46 }
 0x2be   :  { %v225_v47 = vpop.xlane.xlu1 %224 }
 0x2bf   :  { %v229_v48 = vmul.f32 0.03125, %v225_v47 }
 0x2c1   :  { %v231_v49 = vadd.f32 1e-05, %v229_v48 }
 0x2c2   :  { %v228_v50 = vpop.xlane.xlu1 %227 }
 0x2c3   :  { %324 = vrsqrt.f32 %v231_v49  ;;  %v230_v51 = vmul.f32 0.03125, %v228_v50 }
 0x2c5   :  { %v232_v52 = vadd.f32 1e-05, %v230_v51 }
 0x2c7   :  { %326 = vrsqrt.f32 %v232_v52 }
 0x2d0   :  { %v325_v53 = vpop.eup %324 }
 0x2d1   :  { %v235_v55 = vmul.f32 %v325_v53, %v219_v39 }
 0x2d3   :  { %v244_v57 = vmul.f32 %v283_v54, %v235_v55 }
 0x2d4   :  { %v327_v58 = vpop.eup %326 }
 0x2d5   :  { %v236_v59 = vmul.f32 %v327_v58, %v220_v43  ;;  %v253_v60 = vadd.f32 %v284_v56, %v244_v57 }
 0x2d7   :  { %v245_v61 = vmul.f32 %v283_v54, %v236_v59  ;;  %255 = vst.msk [vmem:[#allocation3] sm:$0xff] %vm32_vm1, %v253_v60 }
 0x2d9   :  { %v254_v62 = vadd.f32 %v284_v56, %v245_v61 }
 0x2db   :  { %256 = vst.msk [vmem:[#allocation3 + $0x8] sm:$0xff] %vm32_vm1, %v254_v62 }
 0x2dc   :  { %339 = shalt.err (!%p336_p4)
}
 0x2dd   :  { %s353_s5 = smov 128   ;;  %s354_s6 = smov 8  }
 0x2de   :  { %268 = dma.vmem_to_hbm [thread:$0]  %s263_s21, 256, %s452_s7, [#allocation4], %s353_s5, %s353_s5, %s354_s6  }
 0x2df   :  { %348 = dma.done.wait [#allocation4], 256  }
 0x2e0   :  { %349 = vsyncadd [#allocation4], 4294967040 }
 0x2e1   :  { %272 = vsyncpa [#allocation4], 1 }

</bundles_post_ra>
